<compile_context>
chip_gen: v7x
topology: tpu7x:2x2x1
jax: 0.10.0
libtpu: 0.0.40
codegen_flags: <defaults>
</compile_context>

<pallas_src>
import functools

import jax
import jax.numpy as jnp
import numpy as np
from jax import lax
from jax.experimental import pallas as pl
from jax.experimental.pallas import tpu as pltpu


# ----------------------------- fused Pallas kernel ------------------------- #

def _lenet_kernel(x_ref, t1_ref, b1_ref, rs1_ref, cs1_ref,
                  t2_ref, b2_ref, rs2_ref, cs2_ref,
                  fw1_ref, fb1_ref, fw2_ref, fb2_ref, fw3_ref, fb3_ref,
                  o_ref, *, blk):
    dot = functools.partial(jnp.dot, preferred_element_type=jnp.float32)
    bf16 = jnp.bfloat16

    # Resident weights (bf16 MXU operands, f32 biases); broadcasts hoisted
    # out of the per-image loop.
    t1 = t1_ref[...]; t2 = t2_ref[...]
    rs1 = rs1_ref[...]; cs1 = cs1_ref[...]
    rs2 = rs2_ref[...]; cs2 = cs2_ref[...]
    b1 = jnp.broadcast_to(b1_ref[...], (28, 168))
    b2 = jnp.broadcast_to(b2_ref[...], (10, 160))

    x = x_ref[...]                                           # (blk, 32, 32) f32

    flat_rows = []
    for i in range(blk):                                     # unrolled, independent chains
        xi = x[i]                                            # (32, 32)

        # conv1 + bias + ReLU: one fused width-Toeplitz matmul, K = 5*32.
        lhs1 = jnp.concatenate([xi[kh:kh + 28, :] for kh in range(5)],
                               axis=1).astype(bf16)          # (28, 160)
        c1 = jnp.maximum(dot(lhs1, t1) + b1, 0.0)            # (28, 168) f32

        # pool1: row-select (even;odd) + sublane max, col-select (even|odd) + lane max.
        rr = dot(rs1, c1.astype(bf16))                       # (28, 168)
        r1 = jnp.maximum(rr[0:14, :], rr[14:28, :])          # (14, 168)
        pp = dot(r1.astype(bf16), cs1)                       # (14, 168)
        p1 = jnp.maximum(pp[:, 0:84], pp[:, 84:168])         # (14, 84)

        # conv2 + bias + ReLU: one fused matmul, K = 5*84.
        lhs2 = jnp.concatenate([p1[kh:kh + 10, :] for kh in range(5)],
                               axis=1).astype(bf16)          # (10, 420)
        c2 = jnp.maximum(dot(lhs2, t2) + b2, 0.0)            # (10, 160)

        # pool2.
        rr2 = dot(rs2, c2.astype(bf16))                      # (10, 160)
        r2 = jnp.maximum(rr2[0:5, :], rr2[5:10, :])          # (5, 160)
        pp2 = dot(r2.astype(bf16), cs2)                      # (5, 160)
        p2 = jnp.maximum(pp2[:, 0:80], pp2[:, 80:160])       # (5, 80)

        # Flatten to the (h, w, c) order matched by the host-reordered fc1 rows.
        flat_rows.append(jnp.concatenate([p2[h:h + 1, :] for h in range(5)],
                                         axis=1))            # (1, 400)

    flat = jnp.concatenate(flat_rows, axis=0)                # (blk, 400) f32

    # fc1 / fc2 / fc3 batched over the block (M = blk fills MXU rows).
    h = jnp.maximum(dot(flat.astype(bf16), fw1_ref[...]) + fb1_ref[...], 0.0)
    h = jnp.maximum(dot(h.astype(bf16), fw2_ref[...]) + fb2_ref[...], 0.0)
    out = dot(h.astype(bf16), fw3_ref[...]) + fb3_ref[...]   # (blk, 128) f32

    if blk < 8:  # pad sublanes so the store is one unmasked (8, 128) tile
        out = jnp.concatenate(
            [out, jnp.zeros((8 - blk, 128), jnp.float32)], axis=0)
    o_ref[0] = out


def _const_spec(shape):
    return pl.BlockSpec(shape, lambda *_: (0,) * len(shape))


def _choose_block(batch):
    # 8 images per grid step when the batch is big enough; otherwise shrink so
    # the grid has >= 2 steps (keeps both v7x TensorCores busy).
    if batch >= 16:
        return 8
    return max(1, batch // 2)


def net_forward(x_nchw, packed, *, block=None):
    """x: (B, 1, 32, 32) f32, packed: host-prepacked weights -> (B, 10) f32."""
    B = x_nchw.shape[0]
    blk = _choose_block(B) if block is None else block
    grid = pl.cdiv(B, blk)
    b_pad = grid * blk

    x = x_nchw[:, 0, :, :].astype(jnp.float32)               # single input channel
    if b_pad != B:                                           # pad batch to a block multiple
        x = jnp.concatenate(
            [x, jnp.zeros((b_pad - B, 32, 32), jnp.float32)], axis=0)

    out = pl.pallas_call(
        functools.partial(_lenet_kernel, blk=blk),
        out_shape=jax.ShapeDtypeStruct((grid, 8, 128), jnp.float32),
        grid=(grid,),
        in_specs=[pl.BlockSpec((blk, 32, 32), lambda b: (b, 0, 0))]
                 + [_const_spec(a.shape) for a in packed],
        out_specs=pl.BlockSpec((1, 8, 128), lambda b: (b, 0, 0)),
        compiler_params=pltpu.CompilerParams(
            dimension_semantics=("parallel",)),
    )(x, *packed)

    return out[:, :blk, :10].reshape(b_pad, 10)[:B]


# ------------------- host-side (one-time) weight packing ------------------- #

def pack_params(params):
    """Build fused Toeplitz / selection / reordered weight matrices (numpy)."""
    w1, b1, w2, b2, fw1, fb1, fw2, fb2, fw3, fb3 = [
        np.asarray(p, np.float32) for p in params]

    # conv1 width-Toeplitz, stacked over kh: (5*32, 28*6).
    T1 = np.zeros((5, 32, 28 * 6), np.float32)
    for kh in range(5):
        for ow in range(28):
            for kw in range(5):
                T1[kh, ow + kw, ow * 6:(ow + 1) * 6] = w1[:, 0, kh, kw]
    T1c = T1.reshape(5 * 32, 28 * 6)
    B1 = np.tile(b1, 28)[None, :]                            # (1, 168)

    # pool1 selectors: rows 0..13 even rows / 14..27 odd rows; cols even|odd.
    RS1 = np.zeros((28, 28), np.float32)
    RS1[np.arange(14), 2 * np.arange(14)] = 1.0
    RS1[14 + np.arange(14), 2 * np.arange(14) + 1] = 1.0
    CS1 = np.zeros((28 * 6, 2 * 14 * 6), np.float32)
    for j in range(14):
        for c in range(6):
            CS1[(2 * j) * 6 + c, j * 6 + c] = 1.0
            CS1[(2 * j + 1) * 6 + c, 84 + j * 6 + c] = 1.0

    # conv2 width-Toeplitz on the pooled (14, 14*6) layout, stacked: (5*84, 10*16).
    T2 = np.zeros((5, 14 * 6, 10 * 16), np.float32)
    for kh in range(5):
        for ow in range(10):
            for kw in range(5):
                T2[kh, (ow + kw) * 6:(ow + kw) * 6 + 6,
                   ow * 16:(ow + 1) * 16] = w2[:, :, kh, kw].T
    T2c = T2.reshape(5 * 84, 10 * 16)
    B2 = np.tile(b2, 10)[None, :]                            # (1, 160)

    # pool2 selectors.
    RS2 = np.zeros((10, 10), np.float32)
    RS2[np.arange(5), 2 * np.arange(5)] = 1.0
    RS2[5 + np.arange(5), 2 * np.arange(5) + 1] = 1.0
    CS2 = np.zeros((10 * 16, 2 * 5 * 16), np.float32)
    for j in range(5):
        for c in range(16):
            CS2[(2 * j) * 16 + c, j * 16 + c] = 1.0
            CS2[(2 * j + 1) * 16 + c, 80 + j * 16 + c] = 1.0

    # fc1: reorder rows from torch's (C, H, W) flatten to our (H, W, C) layout.
    FW1 = np.zeros((400, 120), np.float32)
    for h in range(5):
        for w in range(5):
            for c in range(16):
                FW1[h * 80 + w * 16 + c, :] = fw1[:, c * 25 + h * 5 + w]
    FB1 = fb1[None, :]                                       # (1, 120)

    FW2 = np.ascontiguousarray(fw2.T)                        # (120, 84)
    FB2 = fb2[None, :]                                       # (1, 84)

    FW3 = np.zeros((84, 128), np.float32)                    # lane-dense fc3
    FW3[:, :10] = fw3.T
    FB3 = np.zeros((1, 128), np.float32)
    FB3[0, :10] = fb3

    bf = lambda a: jnp.asarray(a, jnp.bfloat16)              # MXU operands
    f32 = lambda a: jnp.asarray(a, jnp.float32)              # biases (VPU path)
    return (bf(T1c), f32(B1), bf(RS1), bf(CS1),
            bf(T2c), f32(B2), bf(RS2), bf(CS2),
            bf(FW1), f32(FB1), bf(FW2), f32(FB2), bf(FW3), f32(FB3))


# ------------------------ deterministic parameters ------------------------- #

def init_params(key):
    def u(k, shape, fan_in):
        bound = 1.0 / np.sqrt(fan_in)
        return jax.random.uniform(k, shape, jnp.float32, -bound, bound)

    ks = jax.random.split(key, 10)
    w1 = u(ks[0], (6, 1, 5, 5), 1 * 5 * 5)
    b1 = u(ks[1], (6,), 1 * 5 * 5)
    w2 = u(ks[2], (16, 6, 5, 5), 6 * 5 * 5)
    b2 = u(ks[3], (16,), 6 * 5 * 5)
    fw1 = u(ks[4], (120, 400), 400)
    fb1 = u(ks[5], (120,), 400)
    fw2 = u(ks[6], (84, 120), 120)
    fb2 = u(ks[7], (84,), 120)
    fw3 = u(ks[8], (10, 84), 84)
    fb3 = u(ks[9], (10,), 84)
    return (w1, b1, w2, b2, fw1, fb1, fw2, fb2, fw3, fb3)


# --------------------------- pure-JAX reference ----------------------------- #

def ref_forward(x, params):
    w1, b1, w2, b2, fw1, fb1, fw2, fb2, fw3, fb3 = params
    hp = lax.Precision.HIGHEST

    def conv(x, w, b):
        y = lax.conv_general_dilated(
            x, w, (1, 1), "VALID",
            dimension_numbers=("NCHW", "OIHW", "NCHW"), precision=hp)
        return jnp.maximum(y + b[None, :, None, None], 0.0)

    def pool(x):
        B, C, H, W = x.shape
        return x.reshape(B, C, H // 2, 2, W // 2, 2).max(axis=(3, 5))

    y = pool(conv(x, w1, b1))
    y = pool(conv(y, w2, b2))
    f = y.reshape(y.shape[0], -1)
    h = jnp.maximum(jnp.dot(f, fw1.T, precision=hp) + fb1, 0.0)
    h = jnp.maximum(jnp.dot(h, fw2.T, precision=hp) + fb2, 0.0)
    return jnp.dot(h, fw3.T, precision=hp) + fb3


if __name__ == "__main__":
    key = jax.random.PRNGKey(0)
    pkey, xkey = jax.random.split(key)
    params = init_params(pkey)
    x = jax.random.normal(xkey, (2, 1, 32, 32), jnp.float32)

    packed = pack_params(params)
    out = jax.block_until_ready(net_forward(x, packed))
    ref = jax.block_until_ready(ref_forward(x, params))

    assert out.shape == (2, 10), out.shape
    np.testing.assert_allclose(np.asarray(out), np.asarray(ref),
                               rtol=2e-2, atol=2e-2)
    print("KERNEL_OK")
</pallas_src>

<mosaic_0001>
module attributes {stable_mosaic.version = 11 : i64} {
  func.func @_lenet_kernel(%arg0: i32, %arg1: memref<1x32x32xf32, #tpu.memory_space<vmem>>, %arg2: memref<160x168xbf16, #tpu.memory_space<vmem>>, %arg3: memref<1x168xf32, #tpu.memory_space<vmem>>, %arg4: memref<28x28xbf16, #tpu.memory_space<vmem>>, %arg5: memref<168x168xbf16, #tpu.memory_space<vmem>>, %arg6: memref<420x160xbf16, #tpu.memory_space<vmem>>, %arg7: memref<1x160xf32, #tpu.memory_space<vmem>>, %arg8: memref<10x10xbf16, #tpu.memory_space<vmem>>, %arg9: memref<160x160xbf16, #tpu.memory_space<vmem>>, %arg10: memref<400x120xbf16, #tpu.memory_space<vmem>>, %arg11: memref<1x120xf32, #tpu.memory_space<vmem>>, %arg12: memref<120x84xbf16, #tpu.memory_space<vmem>>, %arg13: memref<1x84xf32, #tpu.memory_space<vmem>>, %arg14: memref<84x128xbf16, #tpu.memory_space<vmem>>, %arg15: memref<1x128xf32, #tpu.memory_space<vmem>>, %arg16: memref<1x8x128xf32, #tpu.memory_space<vmem>>) attributes {dimension_semantics = [#tpu.dimension_semantics<parallel>], iteration_bounds = array<i64: 2>, scalar_prefetch = 0 : i64, scratch_operands = 0 : i64, tpu.core_type = #tpu.core_type<tc>, window_params = [{transform_indices = @transform_0, window_bounds = array<i64: 1, 32, 32>}, {pipeline_mode = #tpu.pipeline_mode<synchronous>, transform_indices = @transform_1, window_bounds = array<i64: 160, 168>}, {pipeline_mode = #tpu.pipeline_mode<synchronous>, transform_indices = @transform_2, window_bounds = array<i64: 1, 168>}, {pipeline_mode = #tpu.pipeline_mode<synchronous>, transform_indices = @transform_3, window_bounds = array<i64: 28, 28>}, {pipeline_mode = #tpu.pipeline_mode<synchronous>, transform_indices = @transform_4, window_bounds = array<i64: 168, 168>}, {pipeline_mode = #tpu.pipeline_mode<synchronous>, transform_indices = @transform_5, window_bounds = array<i64: 420, 160>}, {pipeline_mode = #tpu.pipeline_mode<synchronous>, transform_indices = @transform_6, window_bounds = array<i64: 1, 160>}, {pipeline_mode = #tpu.pipeline_mode<synchronous>, transform_indices = @transform_7, window_bounds = array<i64: 10, 10>}, {pipeline_mode = #tpu.pipeline_mode<synchronous>, transform_indices = @transform_8, window_bounds = array<i64: 160, 160>}, {pipeline_mode = #tpu.pipeline_mode<synchronous>, transform_indices = @transform_9, window_bounds = array<i64: 400, 120>}, {pipeline_mode = #tpu.pipeline_mode<synchronous>, transform_indices = @transform_10, window_bounds = array<i64: 1, 120>}, {pipeline_mode = #tpu.pipeline_mode<synchronous>, transform_indices = @transform_11, window_bounds = array<i64: 120, 84>}, {pipeline_mode = #tpu.pipeline_mode<synchronous>, transform_indices = @transform_12, window_bounds = array<i64: 1, 84>}, {pipeline_mode = #tpu.pipeline_mode<synchronous>, transform_indices = @transform_13, window_bounds = array<i64: 84, 128>}, {pipeline_mode = #tpu.pipeline_mode<synchronous>, transform_indices = @transform_14, window_bounds = array<i64: 1, 128>}, {transform_indices = @transform_15, window_bounds = array<i64: 1, 8, 128>}]} {
    %c0 = arith.constant 0 : index
    %c0_0 = arith.constant 0 : index
    %0 = vector.load %arg2[%c0, %c0_0] : memref<160x168xbf16, #tpu.memory_space<vmem>>, vector<160x168xbf16>
    %c0_1 = arith.constant 0 : index
    %c0_2 = arith.constant 0 : index
    %1 = vector.load %arg6[%c0_1, %c0_2] : memref<420x160xbf16, #tpu.memory_space<vmem>>, vector<420x160xbf16>
    %c0_3 = arith.constant 0 : index
    %c0_4 = arith.constant 0 : index
    %2 = vector.load %arg4[%c0_3, %c0_4] : memref<28x28xbf16, #tpu.memory_space<vmem>>, vector<28x28xbf16>
    %c0_5 = arith.constant 0 : index
    %c0_6 = arith.constant 0 : index
    %3 = vector.load %arg5[%c0_5, %c0_6] : memref<168x168xbf16, #tpu.memory_space<vmem>>, vector<168x168xbf16>
    %c0_7 = arith.constant 0 : index
    %c0_8 = arith.constant 0 : index
    %4 = vector.load %arg8[%c0_7, %c0_8] : memref<10x10xbf16, #tpu.memory_space<vmem>>, vector<10x10xbf16>
    %c0_9 = arith.constant 0 : index
    %c0_10 = arith.constant 0 : index
    %5 = vector.load %arg9[%c0_9, %c0_10] : memref<160x160xbf16, #tpu.memory_space<vmem>>, vector<160x160xbf16>
    %c0_11 = arith.constant 0 : index
    %c0_12 = arith.constant 0 : index
    %6 = vector.load %arg3[%c0_11, %c0_12] : memref<1x168xf32, #tpu.memory_space<vmem>>, vector<1x168xf32>
    %7 = vector.shape_cast %6 : vector<1x168xf32> to vector<1x168xf32>
    %8 = vector.broadcast %7 : vector<1x168xf32> to vector<28x168xf32>
    %c0_13 = arith.constant 0 : index
    %c0_14 = arith.constant 0 : index
    %9 = vector.load %arg7[%c0_13, %c0_14] : memref<1x160xf32, #tpu.memory_space<vmem>>, vector<1x160xf32>
    %10 = vector.shape_cast %9 : vector<1x160xf32> to vector<1x160xf32>
    %11 = vector.broadcast %10 : vector<1x160xf32> to vector<10x160xf32>
    %c0_15 = arith.constant 0 : index
    %c0_16 = arith.constant 0 : index
    %c0_17 = arith.constant 0 : index
    %12 = vector.load %arg1[%c0_15, %c0_16, %c0_17] : memref<1x32x32xf32, #tpu.memory_space<vmem>>, vector<1x32x32xf32>
    %13 = vector.shape_cast %12 : vector<1x32x32xf32> to vector<32x32xf32>
    %14 = vector.extract_strided_slice %13 {offsets = [0, 0], sizes = [28, 32], strides = [1, 1]} : vector<32x32xf32> to vector<28x32xf32>
    %15 = vector.extract_strided_slice %13 {offsets = [1, 0], sizes = [28, 32], strides = [1, 1]} : vector<32x32xf32> to vector<28x32xf32>
    %16 = vector.extract_strided_slice %13 {offsets = [2, 0], sizes = [28, 32], strides = [1, 1]} : vector<32x32xf32> to vector<28x32xf32>
    %17 = vector.extract_strided_slice %13 {offsets = [3, 0], sizes = [28, 32], strides = [1, 1]} : vector<32x32xf32> to vector<28x32xf32>
    %18 = vector.extract_strided_slice %13 {offsets = [4, 0], sizes = [28, 32], strides = [1, 1]} : vector<32x32xf32> to vector<28x32xf32>
    %19 = tpu.concatenate %14, %15, %16, %17, %18 in 1 : vector<28x32xf32>, vector<28x32xf32>, vector<28x32xf32>, vector<28x32xf32>, vector<28x32xf32> -> vector<28x160xf32>
    %20 = arith.truncf %19 : vector<28x160xf32> to vector<28x160xbf16>
    %cst = arith.constant dense<0.000000e+00> : vector<28x168xf32>
    %21 = tpu.matmul %20, %0, %cst {dimension_numbers = #tpu.dot_dimension_numbers<[1], [0], [0], [1], [0, 0, 1, 1], [], []>} : vector<28x160xbf16>, vector<160x168xbf16>, vector<28x168xf32> -> vector<28x168xf32>
    %22 = arith.addf %21, %8 : vector<28x168xf32>
    %cst_18 = arith.constant 0.000000e+00 : f32
    %23 = vector.broadcast %cst_18 : f32 to vector<28x168xf32>
    %24 = arith.maximumf %22, %23 : vector<28x168xf32>
    %25 = arith.truncf %24 : vector<28x168xf32> to vector<28x168xbf16>
    %cst_19 = arith.constant dense<0.000000e+00> : vector<28x168xf32>
    %26 = tpu.matmul %2, %25, %cst_19 {dimension_numbers = #tpu.dot_dimension_numbers<[1], [0], [0], [1], [0, 0, 1, 1], [], []>} : vector<28x28xbf16>, vector<28x168xbf16>, vector<28x168xf32> -> vector<28x168xf32>
    %27 = vector.extract_strided_slice %26 {offsets = [0, 0], sizes = [14, 168], strides = [1, 1]} : vector<28x168xf32> to vector<14x168xf32>
    %28 = vector.extract_strided_slice %26 {offsets = [14, 0], sizes = [14, 168], strides = [1, 1]} : vector<28x168xf32> to vector<14x168xf32>
    %29 = arith.maximumf %27, %28 : vector<14x168xf32>
    %30 = arith.truncf %29 : vector<14x168xf32> to vector<14x168xbf16>
    %cst_20 = arith.constant dense<0.000000e+00> : vector<14x168xf32>
    %31 = tpu.matmul %30, %3, %cst_20 {dimension_numbers = #tpu.dot_dimension_numbers<[1], [0], [0], [1], [0, 0, 1, 1], [], []>} : vector<14x168xbf16>, vector<168x168xbf16>, vector<14x168xf32> -> vector<14x168xf32>
    %32 = vector.extract_strided_slice %31 {offsets = [0, 0], sizes = [14, 84], strides = [1, 1]} : vector<14x168xf32> to vector<14x84xf32>
    %33 = vector.extract_strided_slice %31 {offsets = [0, 84], sizes = [14, 84], strides = [1, 1]} : vector<14x168xf32> to vector<14x84xf32>
    %34 = arith.maximumf %32, %33 : vector<14x84xf32>
    %35 = vector.extract_strided_slice %34 {offsets = [0, 0], sizes = [10, 84], strides = [1, 1]} : vector<14x84xf32> to vector<10x84xf32>
    %36 = vector.extract_strided_slice %34 {offsets = [1, 0], sizes = [10, 84], strides = [1, 1]} : vector<14x84xf32> to vector<10x84xf32>
    %37 = vector.extract_strided_slice %34 {offsets = [2, 0], sizes = [10, 84], strides = [1, 1]} : vector<14x84xf32> to vector<10x84xf32>
    %38 = vector.extract_strided_slice %34 {offsets = [3, 0], sizes = [10, 84], strides = [1, 1]} : vector<14x84xf32> to vector<10x84xf32>
    %39 = vector.extract_strided_slice %34 {offsets = [4, 0], sizes = [10, 84], strides = [1, 1]} : vector<14x84xf32> to vector<10x84xf32>
    %40 = tpu.concatenate %35, %36, %37, %38, %39 in 1 : vector<10x84xf32>, vector<10x84xf32>, vector<10x84xf32>, vector<10x84xf32>, vector<10x84xf32> -> vector<10x420xf32>
    %41 = arith.truncf %40 : vector<10x420xf32> to vector<10x420xbf16>
    %cst_21 = arith.constant dense<0.000000e+00> : vector<10x160xf32>
    %42 = tpu.matmul %41, %1, %cst_21 {dimension_numbers = #tpu.dot_dimension_numbers<[1], [0], [0], [1], [0, 0, 1, 1], [], []>} : vector<10x420xbf16>, vector<420x160xbf16>, vector<10x160xf32> -> vector<10x160xf32>
    %43 = arith.addf %42, %11 : vector<10x160xf32>
    %cst_22 = arith.constant 0.000000e+00 : f32
    %44 = vector.broadcast %cst_22 : f32 to vector<10x160xf32>
    %45 = arith.maximumf %43, %44 : vector<10x160xf32>
    %46 = arith.truncf %45 : vector<10x160xf32> to vector<10x160xbf16>
    %cst_23 = arith.constant dense<0.000000e+00> : vector<10x160xf32>
    %47 = tpu.matmul %4, %46, %cst_23 {dimension_numbers = #tpu.dot_dimension_numbers<[1], [0], [0], [1], [0, 0, 1, 1], [], []>} : vector<10x10xbf16>, vector<10x160xbf16>, vector<10x160xf32> -> vector<10x160xf32>
    %48 = vector.extract_strided_slice %47 {offsets = [0, 0], sizes = [5, 160], strides = [1, 1]} : vector<10x160xf32> to vector<5x160xf32>
    %49 = vector.extract_strided_slice %47 {offsets = [5, 0], sizes = [5, 160], strides = [1, 1]} : vector<10x160xf32> to vector<5x160xf32>
    %50 = arith.maximumf %48, %49 : vector<5x160xf32>
    %51 = arith.truncf %50 : vector<5x160xf32> to vector<5x160xbf16>
    %cst_24 = arith.constant dense<0.000000e+00> : vector<5x160xf32>
    %52 = tpu.matmul %51, %5, %cst_24 {dimension_numbers = #tpu.dot_dimension_numbers<[1], [0], [0], [1], [0, 0, 1, 1], [], []>} : vector<5x160xbf16>, vector<160x160xbf16>, vector<5x160xf32> -> vector<5x160xf32>
    %53 = vector.extract_strided_slice %52 {offsets = [0, 0], sizes = [5, 80], strides = [1, 1]} : vector<5x160xf32> to vector<5x80xf32>
    %54 = vector.extract_strided_slice %52 {offsets = [0, 80], sizes = [5, 80], strides = [1, 1]} : vector<5x160xf32> to vector<5x80xf32>
    %55 = arith.maximumf %53, %54 : vector<5x80xf32>
    %56 = vector.extract_strided_slice %55 {offsets = [0, 0], sizes = [1, 80], strides = [1, 1]} : vector<5x80xf32> to vector<1x80xf32>
    %57 = vector.extract_strided_slice %55 {offsets = [1, 0], sizes = [1, 80], strides = [1, 1]} : vector<5x80xf32> to vector<1x80xf32>
    %58 = vector.extract_strided_slice %55 {offsets = [2, 0], sizes = [1, 80], strides = [1, 1]} : vector<5x80xf32> to vector<1x80xf32>
    %59 = vector.extract_strided_slice %55 {offsets = [3, 0], sizes = [1, 80], strides = [1, 1]} : vector<5x80xf32> to vector<1x80xf32>
    %60 = vector.extract_strided_slice %55 {offsets = [4, 0], sizes = [1, 80], strides = [1, 1]} : vector<5x80xf32> to vector<1x80xf32>
    %61 = tpu.concatenate %56, %57, %58, %59, %60 in 1 : vector<1x80xf32>, vector<1x80xf32>, vector<1x80xf32>, vector<1x80xf32>, vector<1x80xf32> -> vector<1x400xf32>
    %62 = arith.truncf %61 : vector<1x400xf32> to vector<1x400xbf16>
    %c0_25 = arith.constant 0 : index
    %c0_26 = arith.constant 0 : index
    %63 = vector.load %arg10[%c0_25, %c0_26] : memref<400x120xbf16, #tpu.memory_space<vmem>>, vector<400x120xbf16>
    %cst_27 = arith.constant dense<0.000000e+00> : vector<1x120xf32>
    %64 = tpu.matmul %62, %63, %cst_27 {dimension_numbers = #tpu.dot_dimension_numbers<[1], [0], [0], [1], [0, 0, 1, 1], [], []>} : vector<1x400xbf16>, vector<400x120xbf16>, vector<1x120xf32> -> vector<1x120xf32>
    %c0_28 = arith.constant 0 : index
    %c0_29 = arith.constant 0 : index
    %65 = vector.load %arg11[%c0_28, %c0_29] : memref<1x120xf32, #tpu.memory_space<vmem>>, vector<1x120xf32>
    %66 = arith.addf %64, %65 : vector<1x120xf32>
    %cst_30 = arith.constant 0.000000e+00 : f32
    %67 = vector.broadcast %cst_30 : f32 to vector<1x120xf32>
    %68 = arith.maximumf %66, %67 : vector<1x120xf32>
    %69 = arith.truncf %68 : vector<1x120xf32> to vector<1x120xbf16>
    %c0_31 = arith.constant 0 : index
    %c0_32 = arith.constant 0 : index
    %70 = vector.load %arg12[%c0_31, %c0_32] : memref<120x84xbf16, #tpu.memory_space<vmem>>, vector<120x84xbf16>
    %cst_33 = arith.constant dense<0.000000e+00> : vector<1x84xf32>
    %71 = tpu.matmul %69, %70, %cst_33 {dimension_numbers = #tpu.dot_dimension_numbers<[1], [0], [0], [1], [0, 0, 1, 1], [], []>} : vector<1x120xbf16>, vector<120x84xbf16>, vector<1x84xf32> -> vector<1x84xf32>
    %c0_34 = arith.constant 0 : index
    %c0_35 = arith.constant 0 : index
    %72 = vector.load %arg13[%c0_34, %c0_35] : memref<1x84xf32, #tpu.memory_space<vmem>>, vector<1x84xf32>
    %73 = arith.addf %71, %72 : vector<1x84xf32>
    %cst_36 = arith.constant 0.000000e+00 : f32
    %74 = vector.broadcast %cst_36 : f32 to vector<1x84xf32>
    %75 = arith.maximumf %73, %74 : vector<1x84xf32>
    %76 = arith.truncf %75 : vector<1x84xf32> to vector<1x84xbf16>
    %c0_37 = arith.constant 0 : index
    %c0_38 = arith.constant 0 : index
    %77 = vector.load %arg14[%c0_37, %c0_38] : memref<84x128xbf16, #tpu.memory_space<vmem>>, vector<84x128xbf16>
    %cst_39 = arith.constant dense<0.000000e+00> : vector<1x128xf32>
    %78 = tpu.matmul %76, %77, %cst_39 {dimension_numbers = #tpu.dot_dimension_numbers<[1], [0], [0], [1], [0, 0, 1, 1], [], []>} : vector<1x84xbf16>, vector<84x128xbf16>, vector<1x128xf32> -> vector<1x128xf32>
    %c0_40 = arith.constant 0 : index
    %c0_41 = arith.constant 0 : index
    %79 = vector.load %arg15[%c0_40, %c0_41] : memref<1x128xf32, #tpu.memory_space<vmem>>, vector<1x128xf32>
    %80 = arith.addf %78, %79 : vector<1x128xf32>
    %cst_42 = arith.constant 0.000000e+00 : f32
    %81 = vector.broadcast %cst_42 : f32 to vector<7x128xf32>
    %82 = tpu.concatenate %80, %81 in 0 : vector<1x128xf32>, vector<7x128xf32> -> vector<8x128xf32>
    %c0_43 = arith.constant 0 : index
    %c0_44 = arith.constant 0 : index
    %c0_45 = arith.constant 0 : index
    %83 = vector.load %arg16[%c0_43, %c0_44, %c0_45] : memref<1x8x128xf32, #tpu.memory_space<vmem>>, vector<1x8x128xf32>
    %84 = vector.shape_cast %83 : vector<1x8x128xf32> to vector<8x128xf32>
    %85 = vector.shape_cast %82 : vector<8x128xf32> to vector<1x8x128xf32>
    tpu.vector_store %arg16[%c0_43, %c0_44, %c0_45], %85 {strides = array<i32>} : memref<1x8x128xf32, #tpu.memory_space<vmem>>, vector<1x8x128xf32>,
    return
  }
  func.func @transform_0(%arg0: i32) -> (i32, i32, i32) {
    %c0_i32 = arith.constant 0 : i32
    %c0_i32_0 = arith.constant 0 : i32
    %c0_i32_1 = arith.constant 0 : i32
    return %arg0, %c0_i32, %c0_i32_0 : i32, i32, i32
  }
  func.func @transform_1(%arg0: i32) -> (i32, i32) {
    %c0_i32 = arith.constant 0 : i32
    %c0_i32_0 = arith.constant 0 : i32
    %c0_i32_1 = arith.constant 0 : i32
    return %c0_i32, %c0_i32_0 : i32, i32
  }
  func.func @transform_2(%arg0: i32) -> (i32, i32) {
    %c0_i32 = arith.constant 0 : i32
    %c0_i32_0 = arith.constant 0 : i32
    %c0_i32_1 = arith.constant 0 : i32
    return %c0_i32, %c0_i32_0 : i32, i32
  }
  func.func @transform_3(%arg0: i32) -> (i32, i32) {
    %c0_i32 = arith.constant 0 : i32
    %c0_i32_0 = arith.constant 0 : i32
    %c0_i32_1 = arith.constant 0 : i32
    return %c0_i32, %c0_i32_0 : i32, i32
  }
  func.func @transform_4(%arg0: i32) -> (i32, i32) {
    %c0_i32 = arith.constant 0 : i32
    %c0_i32_0 = arith.constant 0 : i32
    %c0_i32_1 = arith.constant 0 : i32
    return %c0_i32, %c0_i32_0 : i32, i32
  }
  func.func @transform_5(%arg0: i32) -> (i32, i32) {
    %c0_i32 = arith.constant 0 : i32
    %c0_i32_0 = arith.constant 0 : i32
    %c0_i32_1 = arith.constant 0 : i32
    return %c0_i32, %c0_i32_0 : i32, i32
  }
  func.func @transform_6(%arg0: i32) -> (i32, i32) {
    %c0_i32 = arith.constant 0 : i32
    %c0_i32_0 = arith.constant 0 : i32
    %c0_i32_1 = arith.constant 0 : i32
    return %c0_i32, %c0_i32_0 : i32, i32
  }
  func.func @transform_7(%arg0: i32) -> (i32, i32) {
    %c0_i32 = arith.constant 0 : i32
    %c0_i32_0 = arith.constant 0 : i32
    %c0_i32_1 = arith.constant 0 : i32
    return %c0_i32, %c0_i32_0 : i32, i32
  }
  func.func @transform_8(%arg0: i32) -> (i32, i32) {
    %c0_i32 = arith.constant 0 : i32
    %c0_i32_0 = arith.constant 0 : i32
    %c0_i32_1 = arith.constant 0 : i32
    return %c0_i32, %c0_i32_0 : i32, i32
  }
  func.func @transform_9(%arg0: i32) -> (i32, i32) {
    %c0_i32 = arith.constant 0 : i32
    %c0_i32_0 = arith.constant 0 : i32
    %c0_i32_1 = arith.constant 0 : i32
    return %c0_i32, %c0_i32_0 : i32, i32
  }
  func.func @transform_10(%arg0: i32) -> (i32, i32) {
    %c0_i32 = arith.constant 0 : i32
    %c0_i32_0 = arith.constant 0 : i32
    %c0_i32_1 = arith.constant 0 : i32
    return %c0_i32, %c0_i32_0 : i32, i32
  }
  func.func @transform_11(%arg0: i32) -> (i32, i32) {
    %c0_i32 = arith.constant 0 : i32
    %c0_i32_0 = arith.constant 0 : i32
    %c0_i32_1 = arith.constant 0 : i32
    return %c0_i32, %c0_i32_0 : i32, i32
  }
  func.func @transform_12(%arg0: i32) -> (i32, i32) {
    %c0_i32 = arith.constant 0 : i32
    %c0_i32_0 = arith.constant 0 : i32
    %c0_i32_1 = arith.constant 0 : i32
    return %c0_i32, %c0_i32_0 : i32, i32
  }
  func.func @transform_13(%arg0: i32) -> (i32, i32) {
    %c0_i32 = arith.constant 0 : i32
    %c0_i32_0 = arith.constant 0 : i32
    %c0_i32_1 = arith.constant 0 : i32
    return %c0_i32, %c0_i32_0 : i32, i32
  }
  func.func @transform_14(%arg0: i32) -> (i32, i32) {
    %c0_i32 = arith.constant 0 : i32
    %c0_i32_0 = arith.constant 0 : i32
    %c0_i32_1 = arith.constant 0 : i32
    return %c0_i32, %c0_i32_0 : i32, i32
  }
  func.func @transform_15(%arg0: i32) -> (i32, i32, i32) {
    %c0_i32 = arith.constant 0 : i32
    %c0_i32_0 = arith.constant 0 : i32
    %c0_i32_1 = arith.constant 0 : i32
    return %arg0, %c0_i32, %c0_i32_0 : i32, i32, i32
  }
}

</mosaic_0001>

<bundles_post_ra>
// kernel: tpu_custom_call.1
= control target key start
LH: loop header
LB: loop body
LE: loop exit
PB: predicated region body
PF: predicated region fallthrough
CT: control target
= control target key end

     0   :  { %s3898_s0 = inlined_call_operand.vmem [shape: f32[2,32,32], index: 0, kind: input, shape index: {}]   ;;  %s3899_s1 = inlined_call_operand.vmem [shape: bf16[160,168], index: 1, kind: input, shape index: {}]   ;;  %s3900_s2 = inlined_call_operand.vmem [shape: f32[1,168], index: 2, kind: input, shape index: {}]   ;;  %s3901_s3 = inlined_call_operand.vmem [shape: bf16[28,28], index: 3, kind: input, shape index: {}]   ;;  %s3902_s4 = inlined_call_operand.vmem [shape: bf16[168,168], index: 4, kind: input, shape index: {}]   ;;  %s3903_s5 = inlined_call_operand.vmem [shape: bf16[420,160], index: 5, kind: input, shape index: {}]   ;;  %s3904_s6 = inlined_call_operand.vmem [shape: f32[1,160], index: 6, kind: input, shape index: {}]   ;;  %s3905_s7 = inlined_call_operand.vmem [shape: bf16[10,10], index: 7, kind: input, shape index: {}]   ;;  %s3906_s8 = inlined_call_operand.vmem [shape: bf16[160,160], index: 8, kind: input, shape index: {}]   ;;  %s3907_s9 = inlined_call_operand.vmem [shape: bf16[400,120], index: 9, kind: input, shape index: {}]   ;;  %s3908_s10 = inlined_call_operand.vmem [shape: f32[1,120], index: 10, kind: input, shape index: {}]   ;;  %s3909_s11 = inlined_call_operand.vmem [shape: bf16[120,84], index: 11, kind: input, shape index: {}]   ;;  %s3910_s12 = inlined_call_operand.vmem [shape: f32[1,84], index: 12, kind: input, shape index: {}]   ;;  %s3911_s13 = inlined_call_operand.vmem [shape: bf16[84,128], index: 13, kind: input, shape index: {}]   ;;  %s3912_s14 = inlined_call_operand.vmem [shape: f32[1,128], index: 14, kind: input, shape index: {}]   ;;  %s3913_s15 = inlined_call_operand.hbm [shape: f32[2,8,128], index: 15, kind: output, shape index: {}]  }
   0x1   :  { %3921 = sst [smem:[#allocation11_spill]] %s3913_s15 }
   0x2   :  { %20 = vsyncpa [#allocation3], 0 }
   0x3   :  { %22 = vsyncpa [#allocation3 + $0x1], 0  ;;  %s3183_s18 = smov 0   ;;  %s3185_s19 = smov 0  }
   0x4   :  { %s3187_s20 = smov 0   ;;  %s3189_s21 = smov 0  }
   0x5 LB: > { %3922 = sst [smem:[#allocation5_spill]] %s3075_s18  ;;  %s3204_s22 = sadd.s32 4294967295, %s3087_s21   ;;  %s3087_s21 = sphi %s3189_s21, %s3934_s21   ;;  %s3083_s20 = sphi %s3187_s20, %s3936_s20   ;;  %s3079_s19 = sphi %s3185_s19, %s3938_s19   ;;  %s3075_s18 = sphi %s3183_s18, %s3937_s18  }
   0x6   : > { %3923 = sst [smem:[#allocation6_spill]] %s3083_s20  ;;  %s2427_s23 = sadd.s32 4294967294, %s3087_s21  }
   0x7   : > { %3924 = sst [smem:[#allocation7_spill]] %s3087_s21  ;;  %s3208_s24 = sadd.s32 1, %s3087_s21  }
   0x8   : > { %3925 = sst [smem:[#allocation8_spill]] %s3208_s24  ;;  %s355_s25 = sadd.s32 1, %s3083_s20 }
   0x9   : > { %s352_s26 = ssub.s32 %s3087_s21, %s3208_s24  ;;  %p365_p0 = scmp.ne.s32.totalorder %s3083_s20, %s3079_s19 }
   0xa   : > { %p353_p1 = scmp.eq.s32.totalorder %s352_s26, 0  ;;  %p366_p2 = scmp.eq.s32.totalorder %s3204_s22, 1 }
   0xb   : > { %p371_p3 = scmp.ne.s32.totalorder %s3079_s19, %s3075_s18  ;;  %p372_p4 = scmp.eq.s32.totalorder %s2427_s23, 1 }
   0xc   : > { %s3219_s27 = scalar_select %p353_p1, %s3083_s20, %s355_s25  }
   0xd   : > { %p3221_p5 = por %p366_p2, %p365_p0  ;;  %p3225_p6 = por %p372_p4, %p371_p3 }
   0xe   : > { %3926 = sst [smem:[#allocation9_spill]] %s3219_s27  ;;  %p2430_p7 = scmp.ge.s32.totalorder %s3087_s21, 1 }
   0xf   : > { %s3928_s29 = scalar_select %p3225_p6, 1, 0 }
  0x10   : > { %p440_p8 = scmp.lt.s32.totalorder %s3087_s21, 3 }
  0x11   : > { %3929 = sst [smem:[#allocation10_spill]] %s3928_s29 }
  0x12   : > { %p441_p9 = pnand %p2430_p7, %p440_p8 }
  0x13   : > { %p488_p10 = scmp.lt.s32.totalorder (!%p441_p9), %s3204_s22, 1  ;;  %v2811_v0 = vld [vmem:[%s3899_s1 + $0x4] ss:$8 sps:$4 sm:$0xff] (!%p441_p9)   ;;  %v2813_v1 = vld [vmem:[%s3899_s1] ss:$8 sps:$4 sm:$0xff] (!%p441_p9)   ;;  %vm646_vm0 = vcmask (!%p441_p9), 1046528  }
  0x14   : > { %444 = sbr.rel (%p441_p9) target bundleno = 2746 (0xaba), region = 80  ;;  %v2814_v2 = vld [vmem:[%s3899_s1 + $0x14] ss:$8 sps:$4 sm:$0xff] (!%p441_p9)   ;;  %843 = vmatprep.subr.bf16.mxu0 (!%p441_p9), %v2811_v0  ;;  %v2816_v3 = vld [vmem:[%s3899_s1 + $0x10] ss:$8 sps:$4 sm:$0xff] (!%p441_p9)   ;;  %vm686_vm1 = vcmask (!%p441_p9), 1044480  }
  0x15   : > { %844 = vmatpush1.bf16.msra.mxu0 (!%p441_p9), %v2813_v1  ;;  %v2817_v4 = vld [vmem:[%s3899_s1 + $0x24] ss:$8 sps:$4 sm:$0xff] (!%p441_p9)   ;;  %vm666_vm2 = vcmask (!%p441_p9), 1045504   ;;  %v2819_v8 = vld [vmem:[%s3899_s1 + $0x20] ss:$8 sps:$4 sm:$0xff] (!%p441_p9)   ;;  %s3089_s29 = smov (!%p441_p9), 32  }
  0x16   : > { %845 = vmatprep.subr.bf16.mxu0 (!%p441_p9), %v2814_v2  ;;  %v2820_v22 = vld [vmem:[%s3899_s1 + $0x34] ss:$8 sps:$4 sm:$0xff] (!%p441_p9)   ;;  %v2822_v31 = vld [vmem:[%s3899_s1 + $0x30] ss:$8 sps:$4 sm:$0xff] (!%p441_p9)   ;;  %vm706_vm3 = vcmask (!%p441_p9), 1043456   ;;  %s3091_s26 = smov (!%p441_p9), 64  }
  0x17   : > { %v2823_v37 = vld [vmem:[%s3899_s1 + $0x44] ss:$8 sps:$4 sm:$0xff] (!%p441_p9)   ;;  %v2825_v43 = vld [vmem:[%s3899_s1 + $0x40] ss:$8 sps:$4 sm:$0xff] (!%p441_p9)   ;;  %v2826_v46 = vld [vmem:[%s3899_s1 + $0x54] ss:$8 sps:$4 sm:$0xff] (!%p441_p9)  }
  0x18   : > { %v2828_v48 = vld [vmem:[%s3899_s1 + $0x50] ss:$8 sps:$4 sm:$0xff] (!%p441_p9)   ;;  %vm718_vm4 = vcmask (!%p441_p9), 261120   ;;  %v2829_v49 = vld [vmem:[%s3899_s1 + $0x64] ss:$8 sps:$4 sm:$0xff] (!%p441_p9)   ;;  %vm723_vm5 = vcmask (!%p441_p9), 523264  }
  0x19   : > { %846 = vmatpush1.bf16.msra.mxu0 (!%p441_p9), %v2816_v3  ;;  %v2831_v50 = vld [vmem:[%s3899_s1 + $0x60] ss:$8 sps:$4 sm:$0xff] (!%p441_p9)   ;;  %v2832_v51 = vld [vmem:[%s3899_s1 + $0x74] ss:$8 sps:$4 sm:$0xff] (!%p441_p9)   ;;  %v2834_v52 = vld [vmem:[%s3899_s1 + $0x70] ss:$8 sps:$4 sm:$0xff] (!%p441_p9)  }
  0x1a   : > { %847 = vmatprep.subr.bf16.mxu0 (!%p441_p9), %v2817_v4  ;;  %v2835_v53 = vld [vmem:[%s3899_s1 + $0x84] ss:$8 sps:$4 sm:$0xff] (!%p441_p9)   ;;  %v2837_v54 = vld [vmem:[%s3899_s1 + $0x80] ss:$8 sps:$4 sm:$0xff] (!%p441_p9)   ;;  %v2838_v55 = vld [vmem:[%s3899_s1 + $0x94] ss:$8 sps:$4 sm:$0xff] (!%p441_p9)  }
  0x1b   : > { %s489_s17 = scalar_select %p488_p10, %s3204_s22, 1  ;;  %v2840_v56 = vld [vmem:[%s3899_s1 + $0x90] ss:$8 sps:$4 sm:$0xff]   ;;  %vm728_vm6 = vcmask 785408   ;;  %vm918_vm7 = vcmask 228352   ;;  %vm990_vm8 = vcmask 1041408  }
  0x1c   : > { %vm1116_vm9 = vcmask 326656   ;;  %s3093_s18 = smov 44   ;;  %vm1181_vm10 = vcmask 359424   ;;  %s3096_s21 = smov 80   ;;  %vm1226_vm11 = vcmask 687104   ;;  %vm1231_vm12 = vcmask 1014784  }
  0x1d   : > { %s2611_s20 = sshll.u32 %s489_s17, 5  ;;  %848 = vmatpush1.bf16.msra.mxu0 %v2819_v8  ;;  %s3090_s17 = smov 96   ;;  %vm1506_vm13 = vcmask 293888   ;;  %vm1234_vm14 = vcmask 654336   ;;  %vm1613_vm15 = vcmask 80896  }
  0x1e   : > { %s492_s30 = scalar_lea.vmem %s3898_s0, %s2611_s20  ;;  %849 = vmatprep.subr.bf16.mxu0 %v2820_v22  ;;  %s3095_s20 = smov 84  }
  0x1f   : > { %v3251_v5 = vld [vmem:[%s492_s30] sm:$0xff]  ;;  %v3253_v6 = vld [vmem:[%s492_s30 + $0x8] sm:$0xff]  ;;  %v3255_v7 = vld [vmem:[%s492_s30 + $0x10] sm:$0xff]  ;;  %s3097_s23 = smov 124   ;;  %s3098_s25 = smov 48  }
  0x20   : > { %v647_v9 = vrot.slane %v3251_v5, 1  ;;  %v648_v10 = vrot.slane %v3253_v6, 1  ;;  %v650_v11 = vrot.slane %v3255_v7, 1  ;;  %v687_v12 = vrot.slane %v3251_v5, 3  ;;  %v3264_v13 = vld [vmem:[%s492_s30 + $0x18] sm:$0xff]  ;;  %s3930_s16 = sld [smem:[#allocation11_spill]] }
  0x21   : > { %v688_v14 = vrot.slane %v3253_v6, 3  ;;  %v690_v15 = vrot.slane %v3255_v7, 3  ;;  %v667_v16 = vrot.slane %v3251_v5, 2  ;;  %v668_v17 = vrot.slane %v3253_v6, 2  ;;  %850 = vmatpush1.bf16.msra.mxu0 %v2822_v31  ;;  %s3102_s15 = smov [#allocation2]  }
  0x22   : > { %v649_v18 = vsel %vm646_vm0, %v647_v9, %v648_v10  ;;  %v651_v19 = vsel %vm646_vm0, %v648_v10, %v650_v11  ;;  %v670_v20 = vrot.slane %v3255_v7, 2  ;;  %v652_v21 = vrot.slane %v3264_v13, 1  ;;  %851 = vmatprep.subr.bf16.mxu0 %v2823_v37 }
  0x23   : > { %v2746_v23 = vpack.i.bf16 %v651_v19, %v649_v18  ;;  %v689_v24 = vsel %vm686_vm1, %v687_v12, %v688_v14  ;;  %v691_v25 = vsel %vm686_vm1, %v688_v14, %v690_v15  ;;  %v669_v26 = vsel %vm666_vm2, %v667_v16, %v668_v17 }
  0x24   : > { %v2756_v27 = vpack.i.bf16 %v691_v25, %v689_v24  ;;  %v671_v28 = vsel %vm666_vm2, %v668_v17, %v670_v20  ;;  %v653_v29 = vsel %vm646_vm0, %v650_v11, %v652_v21  ;;  %v672_v30 = vrot.slane %v3264_v13, 2 }
  0x25   : > { %2747 = vrot.lane.b32.xlu0 %v2746_v23, %s3089_s29  ;;  %v2751_v32 = vpack.i.bf16 %v671_v28, %v669_v26  ;;  %v692_v33 = vrot.slane %v3264_v13, 3  ;;  %v707_v34 = vrot.slane %v3251_v5, 4  ;;  %v2761_v35 = vpack.i.bf16 %v652_v21, %v653_v29  ;;  %852 = vmatpush1.bf16.msra.mxu0 %v2825_v43 }
  0x26   : > { %2757 = vrot.lane.b32.xlu1 %v2756_v27, %s3090_s17  ;;  %v673_v36 = vsel %vm666_vm2, %v670_v20, %v672_v30  ;;  %v708_v38 = vrot.slane %v3253_v6, 4  ;;  %v710_v40 = vrot.slane %v3255_v7, 4  ;;  %853 = vmatprep.subr.bf16.mxu0 %v2826_v46  ;;  %v712_v58 = vrot.slane %v3264_v13, 4 }
  0x27   : > { %v693_v39 = vsel %vm686_vm1, %v690_v15, %v692_v33  ;;  %v2766_v42 = vpack.i.bf16 %v672_v30, %v673_v36  ;;  %v3092_v28 = vmov 0   ;;  %v616_v29 = vlaneseq }
  0x28   : > { %v709_v41 = vsel %vm706_vm3, %v707_v34, %v708_v38  ;;  %v711_v44 = vsel %vm706_vm3, %v708_v38, %v710_v40  ;;  %v2771_v45 = vpack.i.bf16 %v692_v33, %v693_v39  ;;  %v713_v1 = vsel %vm706_vm3, %v710_v40, %v712_v58  ;;  %963 = vmatprep.mubr.bf16.mxu1 %v3092_v28 }
  0x29   : > { %2752 = vrot.lane.b32.xlu0 %v2751_v32, %s3091_s26  ;;  %v734_v47 = vpack.c.bf16 %v711_v44, %v709_v41  ;;  %854 = vmatpush1.bf16.msra.mxu0 %v2828_v48  ;;  %v736_v15 = vpack.c.bf16 %v712_v58, %v713_v1  ;;  %v3355_v30 = vshrl.u32 %v616_v29, 7  ;;  %v614_v32 = vld [vmem:[%s3900_s2] sm:$0x3] }
  0x2a   : > { %2762 = vrot.lane.b32.xlu1 %v2761_v35, %s3089_s29  ;;  %855 = vmatprep.subr.bf16.mxu0 %v2829_v49 }
  0x2b   : > { %2454 = vmatprep.mubr.msk.bf16.mxu0 %vm718_vm4, %v734_v47  ;;  %v618_v31 = vsub.s32 0, %v3355_v30  ;;  %v622_v33 = vsub.s32 1, %v3355_v30  ;;  %v2955_v30 = vld [vmem:[%s3905_s7] sm:$0x1f]  }
  0x2d   : > { %2767 = vrot.lane.b32.xlu0 %v2766_v42, %s3091_s26  ;;  %856 = vmatpush1.bf16.msra.mxu0 %v2831_v50  ;;  %v619_v34 = vrot.slane %v614_v32, %v618_v31  ;;  %v623_v35 = vrot.slane %v614_v32, %v622_v33 }
  0x2e   : > { %2772 = vrot.lane.b32.xlu1 %v2771_v45, %s3090_s17  ;;  %857 = vmatprep.subr.bf16.mxu0 %v2832_v51  ;;  %s3094_s17 = smov 40  }
  0x31   : > { %858 = vmatpush1.bf16.msra.mxu0 %v2834_v52 }
  0x32   : > { %859 = vmatprep.subr.bf16.mxu0 %v2835_v53 }
  0x35   : > { %860 = vmatpush1.bf16.msra.mxu0 %v2837_v54 }
  0x36   : > { %861 = vmatprep.subr.bf16.mxu0 %v2838_v55 }
  0x39   : > { %862 = vmatpush1.bf16.msra.mxu0 %v2840_v56 }
  0x97   : > { %v2748_v57 = vpop.permute.xlu0 %2747 }
  0x98   : > { %v2758_v59 = vpop.permute.xlu1 %2757  ;;  %v2750_v60 = vunpack.i.h.bf16 %v2748_v57  ;;  %v2749_v61 = vunpack.i.l.bf16 %v2748_v57 }
  0x99   : > { %v2760_v62 = vunpack.i.h.bf16 %v2758_v59  ;;  %v2759_v63 = vunpack.i.l.bf16 %v2758_v59 }
  0x9a   : > { %v720_v8 = vsel %vm718_vm4, %v3253_v6, %v2750_v60  ;;  %v719_v9 = vsel %vm718_vm4, %v3251_v5, %v2749_v61 }
  0x9b   : > { %v2753_v0 = vpop.permute.xlu0 %2752 }
  0x9c   : > { %v2755_v2 = vunpack.i.h.bf16 %v2753_v0  ;;  %v2754_v3 = vunpack.i.l.bf16 %v2753_v0  ;;  %v2763_v4 = vpop.permute.xlu1 %2762  ;;  %v2845_v0 = vld [vmem:[%s3902_s4 + $0x4] ss:$8 sps:$4 sm:$0xff]  }
  0x9d   : > { %v2765_v10 = vunpack.i.h.bf16 %v2763_v4  ;;  %v2764_v11 = vunpack.i.l.bf16 %v2763_v4  ;;  %v2848_v4 = vld [vmem:[%s3902_s4 + $0x14] ss:$8 sps:$4 sm:$0xff]  }
  0x9e   : > { %v724_v12 = vsel %vm723_vm5, %v719_v9, %v2754_v3  ;;  %v725_v14 = vsel %vm723_vm5, %v720_v8, %v2755_v2  ;;  %v2841_v2 = vld [vmem:[%s3901_s3] sm:$0xff]   ;;  %v2846_v8 = vld [vmem:[%s3902_s4 + $0x10] ss:$8 sps:$4 sm:$0xff]  }
  0x9f   : > { %v722_v16 = vsel %vm718_vm4, %v3264_v13, %v2765_v10  ;;  %v721_v17 = vsel %vm718_vm4, %v3255_v7, %v2764_v11  ;;  %v2768_v18 = vpop.permute.xlu0 %2767  ;;  %v729_v19 = vsel %vm728_vm6, %v724_v12, %v2759_v63  ;;  %v730_v6 = vsel %vm728_vm6, %v725_v14, %v2760_v62  ;;  %v2843_v3 = vld [vmem:[%s3902_s4] ss:$8 sps:$4 sm:$0xff]   ;;  %v2851_v9 = vld [vmem:[%s3902_s4 + $0x24] ss:$8 sps:$4 sm:$0xff]   ;;  %v2854_v12 = vld [vmem:[%s3902_s4 + $0x34] ss:$8 sps:$4 sm:$0xff]  }
  0xa0   : > { %v2770_v20 = vunpack.i.h.bf16 %v2768_v18  ;;  %v2769_v5 = vunpack.i.l.bf16 %v2768_v18  ;;  %v2773_v21 = vpop.permute.xlu1 %2772  ;;  %v733_v22 = vpack.c.bf16 %v730_v6, %v729_v19  ;;  %v2842_v10 = vld [vmem:[%s3901_s3 + $0x8] sm:$0x3f]   ;;  %v2852_v14 = vld [vmem:[%s3902_s4 + $0x30] ss:$8 sps:$4 sm:$0xff]  }
  0xa1   : > { %v2775_v23 = vunpack.i.h.bf16 %v2773_v21  ;;  %v2774_v24 = vunpack.i.l.bf16 %v2773_v21  ;;  %v2849_v11 = vld [vmem:[%s3902_s4 + $0x20] ss:$8 sps:$4 sm:$0xff]   ;;  %v2858_v18 = vld [vmem:[%s3902_s4 + $0x50] ss:$8 sps:$4 sm:$0xff]   ;;  %v2863_v19 = vld [vmem:[%s3902_s4 + $0x64] ss:$8 sps:$4 sm:$0xff]  }
  0xa2   : > { %v727_v25 = vsel %vm723_vm5, %v722_v16, %v2770_v20  ;;  %v726_v26 = vsel %vm723_vm5, %v721_v17, %v2769_v5  ;;  %876 = vmatmul.mubr.bf16.vlgmr.msra.gmra.mrb[0].mxu0 %v733_v22  ;;  %v2855_v16 = vld [vmem:[%s3902_s4 + $0x40] ss:$8 sps:$4 sm:$0xff]   ;;  %v2860_v17 = vld [vmem:[%s3902_s4 + $0x54] ss:$8 sps:$4 sm:$0xff]   ;;  %v2864_v5 = vld [vmem:[%s3902_s4 + $0x70] ss:$8 sps:$4 sm:$0xff]  }
  0xa3   : > { %2455 = vmatprep.mubr.msk.bf16.mxu0 %vm718_vm4, %v736_v15  ;;  %v731_v7 = vsel %vm728_vm6, %v726_v26, %v2774_v24  ;;  %v732_v13 = vsel %vm728_vm6, %v727_v25, %v2775_v23  ;;  %v2857_v15 = vld [vmem:[%s3902_s4 + $0x44] ss:$8 sps:$4 sm:$0xff]   ;;  %v2861_v6 = vld [vmem:[%s3902_s4 + $0x60] ss:$8 sps:$4 sm:$0xff]   ;;  %v2866_v20 = vld [vmem:[%s3902_s4 + $0x74] ss:$8 sps:$4 sm:$0xff]  }
  0xa4   : > { %v735_v27 = vpack.c.bf16 %v732_v13, %v731_v7  ;;  %v2869_v21 = vld [vmem:[%s3902_s4 + $0x84] ss:$8 sps:$4 sm:$0xff]   ;;  %v2867_v22 = vld [vmem:[%s3902_s4 + $0x80] ss:$8 sps:$4 sm:$0xff]   ;;  %v2872_v23 = vld [vmem:[%s3902_s4 + $0x94] ss:$8 sps:$4 sm:$0xff]  }
  0xa5   : > { %v2870_v24 = vld [vmem:[%s3902_s4 + $0x90] ss:$8 sps:$4 sm:$0xff]   ;;  %v591_v25 = vld [vmem:[%s3902_s4 + $0xa0] sm:$0xff]  ;;  %vm2064_vm6 = vcmask 130048  }
  0xa6   : > { %v2482_v26 = vcombine.high %v591_v25, %v591_v25  ;;  %v2481_v7 = vcombine.low %v591_v25, %v591_v25  ;;  %v2916_v25 = vld [vmem:[%s3903_s5 + $0xd4] ss:$8 sps:$4 sm:$0xff]  }
  0xa8   : > { %v1121_v13 = vsel %vm706_vm3, %v2481_v7, 0 }
  0xaa   : > { %886 = vmatmul.mubr.bf16.gmra.mrb[4].mxu0 %v735_v27 }
 0x175   : > { %v877_v36 = vpop.f32.mrb[0].mxu0 }
 0x176   : > { %v878_v37 = vadd.f32 %v877_v36, %v619_v34  ;;  %v879_v38 = vpop.f32.mrb[1].mxu0 }
 0x177   : > { %v880_v39 = vadd.f32 %v879_v38, %v623_v35  ;;  %v881_v40 = vpop.f32.mrb[2].mxu0 }
 0x178   : > { %v882_v41 = vadd.f32 %v881_v40, %v619_v34  ;;  %v883_v42 = vpop.f32.mrb[3].mxu0  ;;  %v896_v44 = vmax.f32 %v878_v37, 0.0 }
 0x179   : > { %v884_v43 = vadd.f32 %v883_v42, %v623_v35  ;;  %v897_v46 = vmax.f32 %v880_v39, 0.0 }
 0x17a   : > { %v898_v45 = vmax.f32 %v882_v41, 0.0 }
 0x17b   : > { %v899_v47 = vmax.f32 %v884_v43, 0.0 }
 0x17c   : > { %v904_v48 = vpack.c.bf16 %v898_v45, %v896_v44 }
 0x17d   : > { %v887_v49 = vpop.f32.mrb[4].mxu0  ;;  %v905_v50 = vpack.c.bf16 %v899_v47, %v897_v46 }
 0x17e   : > { %v888_v51 = vadd.f32 %v887_v49, %v619_v34  ;;  %v889_v52 = vpop.f32.mrb[5].mxu0 }
 0x17f   : > { %v890_v53 = vadd.f32 %v889_v52, %v623_v35  ;;  %v891_v54 = vpop.f32.mrb[6].mxu0  ;;  %931 = vmatprep.subr.bf16.mxu1 %v905_v50 }
 0x180   : > { %v892_v55 = vadd.f32 %v891_v54, %v619_v34  ;;  %v893_v56 = vpop.f32.mrb[7].mxu0  ;;  %932 = vmatpush1.bf16.msra.mxu1 %v904_v48  ;;  %v900_v58 = vmax.f32 %v888_v51, 0.0 }
 0x181   : > { %v894_v57 = vadd.f32 %v893_v56, %v623_v35  ;;  %v901_v60 = vmax.f32 %v890_v53, 0.0 }
 0x182   : > { %v902_v59 = vmax.f32 %v892_v55, 0.0 }
 0x183   : > { %v903_v61 = vmax.f32 %v894_v57, 0.0 }
 0x184   : > { %v906_v62 = vpack.c.bf16 %v902_v59, %v900_v58 }
 0x185   : > { %v907_v63 = vpack.c.bf16 %v903_v61, %v901_v60  ;;  %v2875_v61 = vld [vmem:[%s3903_s5] ss:$8 sps:$4 sm:$0xff]  }
 0x186   : > { %v926_v1 = vsel %vm666_vm2, %v906_v62, 0  ;;  %v2877_v62 = vld [vmem:[%s3903_s5 + $0x4] ss:$8 sps:$4 sm:$0xff]  }
 0x187   : > { %2458 = vmatprep.subr.msk.bf16.mxu1 %vm666_vm2, %v907_v63  ;;  %v2880_v63 = vld [vmem:[%s3903_s5 + $0x14] ss:$8 sps:$4 sm:$0xff]   ;;  %1516 = vmatprep.subr.bf16.mxu0 %v2877_v62 }
 0x188   : > { %934 = vmatpush1.bf16.msra.mxu1 %v926_v1  ;;  %1517 = vmatpush1.bf16.msra.mxu0 %v2875_v61  ;;  %v2883_v1 = vld [vmem:[%s3903_s5 + $0x24] ss:$8 sps:$4 sm:$0xff]  }
 0x189   : > { %1126 = vmatprep.subr.bf16.mxu1 %v2845_v0  ;;  %v2878_v0 = vld [vmem:[%s3903_s5 + $0x10] ss:$8 sps:$4 sm:$0xff]   ;;  %1518 = vmatprep.subr.bf16.mxu0 %v2880_v63 }
 0x18b   : > { %2459 = vmatmul.mubr.msk.bf16.vlgmr.msra.gmra.mrb[0].mxu1 %vm918_vm7, %v2841_v2  ;;  %v2881_v2 = vld [vmem:[%s3903_s5 + $0x20] ss:$8 sps:$4 sm:$0xff]  }
 0x18c   : > { %973 = vmatprep.mubr.bf16.mxu1 %v3092_v28  ;;  %1127 = vmatpush1.bf16.msra.mxu1 %v2843_v3  ;;  %v2886_v3 = vld [vmem:[%s3903_s5 + $0x34] ss:$8 sps:$4 sm:$0xff]  }
 0x18d   : > { %1128 = vmatprep.subr.bf16.mxu1 %v2848_v4  ;;  %1519 = vmatpush1.bf16.msra.mxu0 %v2878_v0  ;;  %v2884_v4 = vld [vmem:[%s3903_s5 + $0x30] ss:$8 sps:$4 sm:$0xff]  }
 0x18e   : > { %1520 = vmatprep.subr.bf16.mxu0 %v2883_v1 }
 0x190   : > { %1129 = vmatpush1.bf16.msra.mxu1 %v2846_v8  ;;  %v2889_v8 = vld [vmem:[%s3903_s5 + $0x44] ss:$8 sps:$4 sm:$0xff]  }
 0x191   : > { %1130 = vmatprep.subr.bf16.mxu1 %v2851_v9  ;;  %1521 = vmatpush1.bf16.msra.mxu0 %v2881_v2  ;;  %v2887_v9 = vld [vmem:[%s3903_s5 + $0x40] ss:$8 sps:$4 sm:$0xff]  }
 0x192   : > { %1522 = vmatprep.subr.bf16.mxu0 %v2886_v3 }
 0x193   : > { %2460 = vmatmul.mubr.msk.bf16.gmra.mrb[4].mxu1 %vm918_vm7, %v2842_v10  ;;  %v2892_v10 = vld [vmem:[%s3903_s5 + $0x54] ss:$8 sps:$4 sm:$0xff]  }
 0x194   : > { %1131 = vmatpush1.bf16.msra.mxu1 %v2849_v11  ;;  %v2890_v11 = vld [vmem:[%s3903_s5 + $0x50] ss:$8 sps:$4 sm:$0xff]  }
 0x195   : > { %1132 = vmatprep.subr.bf16.mxu1 %v2854_v12  ;;  %1523 = vmatpush1.bf16.msra.mxu0 %v2884_v4  ;;  %v2895_v12 = vld [vmem:[%s3903_s5 + $0x64] ss:$8 sps:$4 sm:$0xff]  }
 0x196   : > { %1524 = vmatprep.subr.bf16.mxu0 %v2889_v8 }
 0x198   : > { %1133 = vmatpush1.bf16.msra.mxu1 %v2852_v14  ;;  %v2893_v14 = vld [vmem:[%s3903_s5 + $0x60] ss:$8 sps:$4 sm:$0xff]  }
 0x199   : > { %1134 = vmatprep.subr.bf16.mxu1 %v2857_v15  ;;  %1525 = vmatpush1.bf16.msra.mxu0 %v2887_v9  ;;  %v2898_v15 = vld [vmem:[%s3903_s5 + $0x74] ss:$8 sps:$4 sm:$0xff]  }
 0x19a   : > { %1526 = vmatprep.subr.bf16.mxu0 %v2892_v10 }
 0x19c   : > { %1135 = vmatpush1.bf16.msra.mxu1 %v2855_v16  ;;  %v2896_v16 = vld [vmem:[%s3903_s5 + $0x70] ss:$8 sps:$4 sm:$0xff]  }
 0x19d   : > { %1136 = vmatprep.subr.bf16.mxu1 %v2860_v17  ;;  %1527 = vmatpush1.bf16.msra.mxu0 %v2890_v11  ;;  %v2901_v17 = vld [vmem:[%s3903_s5 + $0x84] ss:$8 sps:$4 sm:$0xff]  }
 0x19e   : > { %1528 = vmatprep.subr.bf16.mxu0 %v2895_v12 }
 0x1a0   : > { %1137 = vmatpush1.bf16.msra.mxu1 %v2858_v18  ;;  %v2899_v18 = vld [vmem:[%s3903_s5 + $0x80] ss:$8 sps:$4 sm:$0xff]  }
 0x1a1   : > { %1138 = vmatprep.subr.bf16.mxu1 %v2863_v19  ;;  %1529 = vmatpush1.bf16.msra.mxu0 %v2893_v14  ;;  %v2904_v19 = vld [vmem:[%s3903_s5 + $0x94] ss:$8 sps:$4 sm:$0xff]  }
 0x1a2   : > { %1530 = vmatprep.subr.bf16.mxu0 %v2898_v15 }
 0x1a4   : > { %1139 = vmatpush1.bf16.msra.mxu1 %v2861_v6  ;;  %v2902_v6 = vld [vmem:[%s3903_s5 + $0x90] ss:$8 sps:$4 sm:$0xff]  }
 0x1a5   : > { %1140 = vmatprep.subr.bf16.mxu1 %v2866_v20  ;;  %1531 = vmatpush1.bf16.msra.mxu0 %v2896_v16  ;;  %v2907_v20 = vld [vmem:[%s3903_s5 + $0xa4] ss:$8 sps:$4 sm:$0xff]  }
 0x1a6   : > { %1532 = vmatprep.subr.bf16.mxu0 %v2901_v17 }
 0x1a8   : > { %1141 = vmatpush1.bf16.msra.mxu1 %v2864_v5  ;;  %v2905_v5 = vld [vmem:[%s3903_s5 + $0xa0] ss:$8 sps:$4 sm:$0xff]  }
 0x1a9   : > { %1142 = vmatprep.subr.bf16.mxu1 %v2869_v21  ;;  %1533 = vmatpush1.bf16.msra.mxu0 %v2899_v18  ;;  %v2910_v21 = vld [vmem:[%s3903_s5 + $0xb4] ss:$8 sps:$4 sm:$0xff]  }
 0x1aa   : > { %1534 = vmatprep.subr.bf16.mxu0 %v2904_v19  ;;  %v2923_v19 = vld [vmem:[%s3903_s5 + $0x100] ss:$8 sps:$4 sm:$0xff]  }
 0x1ac   : > { %1143 = vmatpush1.bf16.msra.mxu1 %v2867_v22  ;;  %v2908_v22 = vld [vmem:[%s3903_s5 + $0xb0] ss:$8 sps:$4 sm:$0xff]  }
 0x1ad   : > { %1144 = vmatprep.subr.bf16.mxu1 %v2872_v23  ;;  %1535 = vmatpush1.bf16.msra.mxu0 %v2902_v6  ;;  %v2913_v23 = vld [vmem:[%s3903_s5 + $0xc4] ss:$8 sps:$4 sm:$0xff]  }
 0x1ae   : > { %1536 = vmatprep.subr.bf16.mxu0 %v2907_v20  ;;  %v2928_v20 = vld [vmem:[%s3903_s5 + $0x114] ss:$8 sps:$4 sm:$0xff]  }
 0x1b0   : > { %1145 = vmatpush1.bf16.msra.mxu1 %v2870_v24  ;;  %v2911_v24 = vld [vmem:[%s3903_s5 + $0xc0] ss:$8 sps:$4 sm:$0xff]  }
 0x1b1   : > { %2483 = vmatprep.subr.msk.bf16.mxu1 %vm706_vm3, %v2482_v26  ;;  %1537 = vmatpush1.bf16.msra.mxu0 %v2905_v5  ;;  %v2914_v26 = vld [vmem:[%s3903_s5 + $0xd0] ss:$8 sps:$4 sm:$0xff]  }
 0x1b2   : > { %1538 = vmatprep.subr.bf16.mxu0 %v2910_v21  ;;  %v2926_v21 = vld [vmem:[%s3903_s5 + $0x110] ss:$8 sps:$4 sm:$0xff]  }
 0x1b4   : > { %1147 = vmatpush1.bf16.msra.mxu1 %v1121_v13  ;;  %v2919_v13 = vld [vmem:[%s3903_s5 + $0xe4] ss:$8 sps:$4 sm:$0xff]  }
 0x1b5   : > { %1539 = vmatpush1.bf16.msra.mxu0 %v2908_v22  ;;  %v2931_v22 = vld [vmem:[%s3903_s5 + $0x124] ss:$8 sps:$4 sm:$0xff]  }
 0x1b6   : > { %1540 = vmatprep.subr.bf16.mxu0 %v2913_v23  ;;  %v2929_v23 = vld [vmem:[%s3903_s5 + $0x120] ss:$8 sps:$4 sm:$0xff]  }
 0x1b9   : > { %1541 = vmatpush1.bf16.msra.mxu0 %v2911_v24  ;;  %v2934_v24 = vld [vmem:[%s3903_s5 + $0x134] ss:$8 sps:$4 sm:$0xff]  }
 0x1ba   : > { %1542 = vmatprep.subr.bf16.mxu0 %v2916_v25  ;;  %v2932_v25 = vld [vmem:[%s3903_s5 + $0x130] ss:$8 sps:$4 sm:$0xff]  }
 0x1bd   : > { %1543 = vmatpush1.bf16.msra.mxu0 %v2914_v26  ;;  %v2937_v26 = vld [vmem:[%s3903_s5 + $0x144] ss:$8 sps:$4 sm:$0xff]  }
 0x1be   : > { %1544 = vmatprep.subr.bf16.mxu0 %v2919_v13  ;;  %v2940_v13 = vld [vmem:[%s3903_s5 + $0x154] ss:$8 sps:$4 sm:$0xff]  }
 0x25e   : > { %v965_v27 = vpop.f32.mrb[0].mxu1 }
 0x25f   : > { %v967_v29 = vpop.f32.mrb[1].mxu1 }
 0x260   : > { %v969_v32 = vpop.f32.mrb[2].mxu1 }
 0x261   : > { %v971_v34 = vpop.f32.mrb[3].mxu1  ;;  %v991_v36 = vrot.slane %v969_v32, 6 }
 0x262   : > { %v994_v39 = vrot.slane %v971_v34, 6 }
 0x266   : > { %v975_v35 = vpop.f32.mrb[4].mxu1 }
 0x267   : > { %v992_v37 = vrot.slane %v975_v35, 6  ;;  %v977_v38 = vpop.f32.mrb[5].mxu1 }
 0x268   : > { %v995_v40 = vrot.slane %v977_v38, 6  ;;  %v979_v41 = vpop.f32.mrb[6].mxu1 }
 0x269   : > { %v993_v42 = vsel %vm990_vm8, %v991_v36, %v992_v37  ;;  %v997_v43 = vrot.slane %v979_v41, 6  ;;  %v981_v44 = vpop.f32.mrb[7].mxu1  ;;  %v2920_v41 = vld [vmem:[%s3903_s5 + $0xf0] ss:$8 sps:$4 sm:$0xff]  }
 0x26a   : > { %v1005_v45 = vmax.f32 %v965_v27, %v993_v42  ;;  %v996_v46 = vsel %vm990_vm8, %v994_v39, %v995_v40  ;;  %v999_v47 = vrot.slane %v981_v44, 6  ;;  %v2922_v39 = vld [vmem:[%s3903_s5 + $0xf4] ss:$8 sps:$4 sm:$0xff]  }
 0x26b   : > { %v1006_v48 = vmax.f32 %v967_v29, %v996_v46  ;;  %v998_v49 = vsel %vm990_vm8, %v992_v37, %v997_v43 }
 0x26c   : > { %v1007_v50 = vmax.f32 %v969_v32, %v998_v49  ;;  %v1000_v51 = vsel %vm990_vm8, %v995_v40, %v999_v47  ;;  %v2917_v32 = vld [vmem:[%s3903_s5 + $0xe0] ss:$8 sps:$4 sm:$0xff]   ;;  %v2925_v49 = vld [vmem:[%s3903_s5 + $0x104] ss:$8 sps:$4 sm:$0xff]  }
 0x26d   : > { %v1008_v52 = vmax.f32 %v971_v34, %v1000_v51  ;;  %1545 = vmatpush1.bf16.msra.mxu0 %v2917_v32  ;;  %v2941_v32 = vld [vmem:[%s3903_s5 + $0x160] ss:$8 sps:$4 sm:$0xff]  }
 0x26e   : > { %v1009_v53 = vpack.c.bf16 %v1007_v50, %v1005_v45  ;;  %1546 = vmatprep.subr.bf16.mxu0 %v2922_v39  ;;  %v566_v39 = vld [vmem:[%s3903_s5 + $0x1a0] sm:$0x33] }
 0x26f   : > { %v1010_v54 = vpack.c.bf16 %v1008_v52, %v1006_v48 }
 0x271   : > { %2484 = vmatprep.mubr.msk.bf16.mxu1 %vm1116_vm9, %v1010_v54  ;;  %1547 = vmatpush1.bf16.msra.mxu0 %v2920_v41  ;;  %v2538_v41 = vcombine.high %v566_v39, %v566_v39 }
 0x272   : > { %1159 = vmatmul.mubr.bf16.vlgmr.msra.gmra.mrb[8].mxu1 %v1009_v53  ;;  %1559 = vmatprep.subr.bf16.mxu0 %v2925_v49  ;;  %v2961_v49 = vld [vmem:[%s3906_s8 + $0x14] ss:$8 sps:$4 sm:$0xff]  }
 0x345   : > { %v3445_v55 = vpop.f32.mrb[8].mxu1 }
 0x346   : > { %v1162_v56 = vpop.f32.mrb[9].mxu1 }
 0x347   : > { %v2776_v57 = vpack.i.bf16 %v1162_v56, %v3445_v55  ;;  %v3448_v58 = vpop.f32.mrb[10].mxu1 }
 0x348   : > { %v1166_v59 = vpop.f32.mrb[11].mxu1 }
 0x349   : > { %v2781_v60 = vpack.i.bf16 %v1166_v59, %v3448_v58  ;;  %2777 = vrot.lane.b32.xlu0 %v2776_v57, %s3093_s18 }
 0x34b   : > { %2782 = vrot.lane.b32.xlu1 %v2781_v60, %s3093_s18  ;;  %s485_s18 = sand.u32 1, %s3079_s19  }
 0x3bb   : > { %v2778_v7 = vpop.permute.xlu0 %2777 }
 0x3bc   : > { %v2780_v27 = vunpack.i.h.bf16 %v2778_v7  ;;  %v2779_v29 = vunpack.i.l.bf16 %v2778_v7  ;;  %v2935_v7 = vld [vmem:[%s3903_s5 + $0x140] ss:$8 sps:$4 sm:$0xff]  }
 0x3bd   : > { %v2783_v34 = vpop.permute.xlu1 %2782 }
 0x3be   : > { %v1182_v35 = vsel %vm1181_vm10, %v2779_v29, %v2780_v27  ;;  %v2785_v36 = vunpack.i.h.bf16 %v2783_v34  ;;  %v2784_v37 = vunpack.i.l.bf16 %v2783_v34  ;;  %v2938_v27 = vld [vmem:[%s3903_s5 + $0x150] ss:$8 sps:$4 sm:$0xff]   ;;  %v2943_v29 = vld [vmem:[%s3903_s5 + $0x164] ss:$8 sps:$4 sm:$0xff]   ;;  %v2946_v34 = vld [vmem:[%s3903_s5 + $0x174] ss:$8 sps:$4 sm:$0xff]  }
 0x3bf   : > { %v1186_v38 = vmax.f32 %v3445_v55, %v1182_v35  ;;  %v2944_v35 = vld [vmem:[%s3903_s5 + $0x170] ss:$8 sps:$4 sm:$0xff]  }
 0x3c0   : > { %v1183_v40 = vsel %vm1181_vm10, %v2784_v37, %v2785_v36  ;;  %v2949_v36 = vld [vmem:[%s3903_s5 + $0x184] ss:$8 sps:$4 sm:$0xff]   ;;  %v2947_v37 = vld [vmem:[%s3903_s5 + $0x180] ss:$8 sps:$4 sm:$0xff]  }
 0x3c1   : > { %v1187_v42 = vmax.f32 %v3448_v58, %v1183_v40  ;;  %v1199_v43 = vrot.slane %v1186_v38, 2  ;;  %v1190_v44 = vrot.slane %v1186_v38, 1  ;;  %v1217_v52 = vrot.slane %v1186_v38, 4  ;;  %v2950_v40 = vld [vmem:[%s3903_s5 + $0x190] ss:$8 sps:$4 sm:$0xff]  }
 0x3c2   : > { %v1208_v53 = vrot.slane %v1186_v38, 3 }
 0x3c3   : > { %v1200_v45 = vrot.slane %v1187_v42, 2  ;;  %v1191_v46 = vrot.slane %v1187_v42, 1  ;;  %v1218_v47 = vrot.slane %v1187_v42, 4  ;;  %v1209_v48 = vrot.slane %v1187_v42, 3 }
 0x3c5   : > { %v1201_v50 = vsel %vm666_vm2, %v1199_v43, %v1200_v45  ;;  %v1192_v51 = vsel %vm646_vm0, %v1190_v44, %v1191_v46  ;;  %v1219_v56 = vsel %vm706_vm3, %v1217_v52, %v1218_v47  ;;  %v1210_v57 = vsel %vm686_vm1, %v1208_v53, %v1209_v48  ;;  %v2962_v52 = vld [vmem:[%s3906_s8 + $0x20] ss:$8 sps:$4 sm:$0xff]   ;;  %v2967_v53 = vld [vmem:[%s3906_s8 + $0x34] ss:$8 sps:$4 sm:$0xff]  }
 0x3c6   : > { %v2791_v54 = vpack.i.bf16 %v1200_v45, %v1201_v50  ;;  %v2786_v55 = vpack.i.bf16 %v1191_v46, %v1192_v51  ;;  %v2801_v58 = vpack.i.bf16 %v1218_v47, %v1219_v56  ;;  %v2796_v59 = vpack.i.bf16 %v1209_v48, %v1210_v57  ;;  %v2956_v47 = vld [vmem:[%s3906_s8] ss:$8 sps:$4 sm:$0xff]   ;;  %v2958_v48 = vld [vmem:[%s3906_s8 + $0x4] ss:$8 sps:$4 sm:$0xff]   ;;  %v2959_v50 = vld [vmem:[%s3906_s8 + $0x10] ss:$8 sps:$4 sm:$0xff]  }
 0x3c7   : > { %1786 = vmatprep.subr.bf16.mxu1 %v2958_v48  ;;  %v2964_v51 = vld [vmem:[%s3906_s8 + $0x24] ss:$8 sps:$4 sm:$0xff]   ;;  %v2968_v56 = vld [vmem:[%s3906_s8 + $0x40] ss:$8 sps:$4 sm:$0xff]   ;;  %v2973_v57 = vld [vmem:[%s3906_s8 + $0x54] ss:$8 sps:$4 sm:$0xff]  }
 0x3c8   : > { %2792 = vrot.lane.b32.xlu1 %v2791_v54, %s3094_s17  ;;  %2787 = vrot.lane.b32.xlu0 %v2786_v55, %s3095_s20  ;;  %v2965_v54 = vld [vmem:[%s3906_s8 + $0x30] ss:$8 sps:$4 sm:$0xff]   ;;  %v2970_v55 = vld [vmem:[%s3906_s8 + $0x44] ss:$8 sps:$4 sm:$0xff]   ;;  %vm1670_vm0 = vcmask 1042432   ;;  %s3099_s17 = smov 112  }
 0x3c9   : > { %1787 = vmatpush1.bf16.msra.mxu1 %v2956_v47  ;;  %v2991_v47 = vld [vmem:[%s3907_s9 + $0x10] sm:$0xff]   ;;  %v2992_v48 = vld [vmem:[%s3907_s9 + $0x58] sm:$0xff]   ;;  %vm1856_vm2 = vcmask 916480  }
 0x3ca   : > { %1788 = vmatprep.subr.bf16.mxu1 %v2961_v49  ;;  %v2993_v49 = vld [vmem:[%s3907_s9 + $0x18] sm:$0xff]  }
 0x3cc   : > { %2802 = vrot.lane.b32.xlu1 %v2801_v58, %s3096_s21  ;;  %2797 = vrot.lane.b32.xlu0 %v2796_v59, %s3097_s23  ;;  %v2971_v58 = vld [vmem:[%s3906_s8 + $0x50] ss:$8 sps:$4 sm:$0xff]   ;;  %v2976_v59 = vld [vmem:[%s3906_s8 + $0x64] ss:$8 sps:$4 sm:$0xff]  }
 0x3cd   : > { %1789 = vmatpush1.bf16.msra.mxu1 %v2959_v50  ;;  %v2994_v50 = vld [vmem:[%s3907_s9 + $0x60] sm:$0xff]  }
 0x3ce   : > { %1790 = vmatprep.subr.bf16.mxu1 %v2964_v51  ;;  %v2995_v51 = vld [vmem:[%s3907_s9 + $0x20] sm:$0xff]  }
 0x3d1   : > { %1791 = vmatpush1.bf16.msra.mxu1 %v2962_v52  ;;  %v2996_v52 = vld [vmem:[%s3907_s9 + $0x68] sm:$0xff]  }
 0x3d2   : > { %1792 = vmatprep.subr.bf16.mxu1 %v2967_v53  ;;  %v2997_v53 = vld [vmem:[%s3907_s9 + $0x28] sm:$0xff]  }
 0x3d5   : > { %1793 = vmatpush1.bf16.msra.mxu1 %v2965_v54  ;;  %v2998_v54 = vld [vmem:[%s3907_s9 + $0x70] sm:$0xff]  }
 0x3d6   : > { %1794 = vmatprep.subr.bf16.mxu1 %v2970_v55  ;;  %v2999_v55 = vld [vmem:[%s3907_s9 + $0x30] sm:$0xff]  }
 0x3d9   : > { %1795 = vmatpush1.bf16.msra.mxu1 %v2968_v56  ;;  %v3000_v56 = vld [vmem:[%s3907_s9 + $0x78] sm:$0xff]  }
 0x3da   : > { %1796 = vmatprep.subr.bf16.mxu1 %v2973_v57  ;;  %v3001_v57 = vld [vmem:[%s3907_s9 + $0x38] sm:$0xff]  }
 0x3dd   : > { %1797 = vmatpush1.bf16.msra.mxu1 %v2971_v58 }
 0x3de   : > { %1798 = vmatprep.subr.bf16.mxu1 %v2976_v59 }
 0x43a   : > { %v2793_v60 = vpop.permute.xlu1 %2792  ;;  %v2788_v61 = vpop.permute.xlu0 %2787 }
 0x43b   : > { %v2795_v62 = vunpack.i.h.bf16 %v2793_v60  ;;  %v2794_v63 = vunpack.i.l.bf16 %v2793_v60  ;;  %v2790_v0 = vunpack.i.h.bf16 %v2788_v61  ;;  %v2789_v1 = vunpack.i.l.bf16 %v2788_v61  ;;  %v2974_v60 = vld [vmem:[%s3906_s8 + $0x60] ss:$8 sps:$4 sm:$0xff]  }
 0x43c   : > { %1799 = vmatpush1.bf16.msra.mxu1 %v2974_v60  ;;  %v626_v61 = vld [vmem:[%s3904_s6] sm:$0x3] }
 0x43d   : > { %v1228_v9 = vsel %vm1226_vm11, %v1187_v42, %v2790_v0  ;;  %v1230_v10 = vsel %vm1116_vm9, %v2790_v0, %v2795_v62  ;;  %v1229_v11 = vsel %vm1116_vm9, %v2789_v1, %v2794_v63  ;;  %v1227_v12 = vsel %vm1226_vm11, %v1186_v38, %v2789_v1  ;;  %v2952_v38 = vld [vmem:[%s3903_s5 + $0x194] ss:$8 sps:$4 sm:$0xff]  }
 0x43e   : > { %v3557_v2 = vpop.permute.xlu1 %2802  ;;  %v3559_v3 = vpop.permute.xlu0 %2797  ;;  %v1237_v6 = vpack.c.bf16 %v1228_v9, %v1227_v12  ;;  %v2537_v42 = vcombine.low %v566_v39, %v566_v39  ;;  %v631_v62 = vrot.slane %v626_v61, %v618_v31  ;;  %v635_v63 = vrot.slane %v626_v61, %v622_v33  ;;  %v2979_v31 = vld [vmem:[%s3906_s8 + $0x74] ss:$8 sps:$4 sm:$0xff]   ;;  %v2977_v33 = vld [vmem:[%s3906_s8 + $0x70] ss:$8 sps:$4 sm:$0xff]  }
 0x43f   : > { %v2800_v4 = vunpack.i.h.bf16 %v3559_v3  ;;  %v2799_v8 = vunpack.i.l.bf16 %v3559_v3  ;;  %v2805_v14 = vunpack.i.h.bf16 %v3557_v2  ;;  %v2804_v15 = vunpack.i.l.bf16 %v3557_v2  ;;  %1800 = vmatprep.subr.bf16.mxu1 %v2979_v31  ;;  %v3005_v31 = vld [vmem:[%s3907_s9 + $0x98] sm:$0xff]  }
 0x440   : > { %v1511_v43 = vsel %vm990_vm8, %v2537_v42, 0  ;;  %1801 = vmatpush1.bf16.msra.mxu1 %v2977_v33  ;;  %v2987_v42 = vld [vmem:[%s3907_s9] sm:$0xff]  }
 0x441   : > { %v1232_v16 = vsel %vm1231_vm12, %v1229_v11, %v2799_v8  ;;  %v1233_v17 = vsel %vm1231_vm12, %v1230_v10, %v2800_v4  ;;  %v1240_v5 = vpack.c.bf16 %v2805_v14, %v2804_v15  ;;  %v1236_v44 = vsel %vm1234_vm14, %v2800_v4, %v2805_v14  ;;  %v3006_v33 = vld [vmem:[%s3907_s9 + $0xa0] sm:$0xff]  }
 0x442   : > { %v1238_v18 = vpack.c.bf16 %v1233_v17, %v1232_v16  ;;  %v1235_v45 = vsel %vm1234_vm14, %v2799_v8, %v2804_v15 }
 0x443   : > { %v1239_v46 = vpack.c.bf16 %v1236_v44, %v1235_v45  ;;  %v2989_v45 = vld [vmem:[%s3907_s9 + $0x8] sm:$0xff]  }
 0x444   : > { %1548 = vmatprep.mubr.bf16.mxu0 %v1238_v18 }
 0x445   : > { %1549 = vmatmul.mubr.bf16.vlgmr.msra.gmra.mrb[8].mxu0 %v1237_v6  ;;  %v2980_v6 = vld [vmem:[%s3906_s8 + $0x80] ss:$8 sps:$4 sm:$0xff]  }
 0x446   : > { %1560 = vmatpush1.bf16.msra.mxu0 %v2923_v19  ;;  %2540 = vmatprep.mubr.msk.bf16.mxu0 %vm1506_vm13, %v1240_v5  ;;  %v2982_v19 = vld [vmem:[%s3906_s8 + $0x84] ss:$8 sps:$4 sm:$0xff]   ;;  %v2983_v5 = vld [vmem:[%s3906_s8 + $0x90] ss:$8 sps:$4 sm:$0xff]  }
 0x447   : > { %1561 = vmatprep.subr.bf16.mxu0 %v2928_v20  ;;  %1802 = vmatprep.subr.bf16.mxu1 %v2982_v19  ;;  %v2985_v20 = vld [vmem:[%s3906_s8 + $0x94] ss:$8 sps:$4 sm:$0xff]   ;;  %v3007_v19 = vld [vmem:[%s3907_s9 + $0xa8] sm:$0xff]  }
 0x448   : > { %1803 = vmatpush1.bf16.msra.mxu1 %v2980_v6  ;;  %v3008_v6 = vld [vmem:[%s3907_s9 + $0xb0] sm:$0xff]  }
 0x449   : > { %1804 = vmatprep.subr.bf16.mxu1 %v2985_v20  ;;  %v3009_v20 = vld [vmem:[%s3907_s9 + $0xb8] sm:$0xff]  }
 0x44a   : > { %1562 = vmatpush1.bf16.msra.mxu0 %v2926_v21 }
 0x44b   : > { %1563 = vmatprep.subr.bf16.mxu0 %v2931_v22 }
 0x44c   : > { %1805 = vmatpush1.bf16.msra.mxu1 %v2983_v5  ;;  %v3010_v5 = vld [vmem:[%s3907_s9 + $0xc0] sm:$0xff]  }
 0x44e   : > { %1564 = vmatpush1.bf16.msra.mxu0 %v2929_v23 }
 0x44f   : > { %1565 = vmatprep.subr.bf16.mxu0 %v2934_v24 }
 0x452   : > { %1566 = vmatpush1.bf16.msra.mxu0 %v2932_v25 }
 0x453   : > { %1567 = vmatprep.subr.bf16.mxu0 %v2937_v26 }
 0x456   : > { %1568 = vmatpush1.bf16.msra.mxu0 %v2935_v7 }
 0x457   : > { %1569 = vmatprep.subr.bf16.mxu0 %v2940_v13 }
 0x45a   : > { %1570 = vmatpush1.bf16.msra.mxu0 %v2938_v27 }
 0x45b   : > { %1571 = vmatprep.subr.bf16.mxu0 %v2943_v29 }
 0x45e   : > { %1572 = vmatpush1.bf16.msra.mxu0 %v2941_v32 }
 0x45f   : > { %1573 = vmatprep.subr.bf16.mxu0 %v2946_v34 }
 0x462   : > { %1574 = vmatpush1.bf16.msra.mxu0 %v2944_v35 }
 0x463   : > { %1575 = vmatprep.subr.bf16.mxu0 %v2949_v36 }
 0x466   : > { %1576 = vmatpush1.bf16.msra.mxu0 %v2947_v37 }
 0x467   : > { %1577 = vmatprep.subr.bf16.mxu0 %v2952_v38 }
 0x46a   : > { %1578 = vmatpush1.bf16.msra.mxu0 %v2950_v40 }
 0x46b   : > { %2539 = vmatprep.subr.msk.bf16.mxu0 %vm990_vm8, %v2538_v41  ;;  %v2986_v41 = vld [vmem:[%s3907_s9 + $0x40] sm:$0xff]  }
 0x46c   : > { %2612 = vmatprep.subr.bf16.mxu1 %v2986_v41 }
 0x46e   : > { %1580 = vmatpush1.bf16.msra.mxu0 %v1511_v43  ;;  %v2988_v43 = vld [vmem:[%s3907_s9 + $0x48] sm:$0xff]  }
 0x471   : > { %1592 = vmatmul.mubr.bf16.vlgmr.msra.gmra.mrb[8].mxu0 %v1239_v46  ;;  %v2990_v46 = vld [vmem:[%s3907_s9 + $0x50] sm:$0xff]  }
 0x472   : > { %1655 = vmatprep.mubr.bf16.mxu0 %v3092_v28 }
 0x544   : > { %v1593_v0 = vpop.f32.mrb[8].mxu0 }
 0x545   : > { %v2686_v1 = vadd.f32 %v1593_v0, %v631_v62  ;;  %v1595_v2 = vpop.f32.mrb[9].mxu0 }
 0x546   : > { %v2687_v3 = vadd.f32 %v1595_v2, %v635_v63  ;;  %v1597_v4 = vpop.f32.mrb[10].mxu0 }
 0x547   : > { %v2688_v8 = vadd.f32 %v1597_v4, %v631_v62  ;;  %v1599_v9 = vpop.f32.mrb[11].mxu0  ;;  %v1602_v11 = vmax.f32 %v2686_v1, 0.0 }
 0x548   : > { %v2689_v10 = vadd.f32 %v1599_v9, %v635_v63  ;;  %v1603_v14 = vmax.f32 %v2687_v3, 0.0 }
 0x549   : > { %v1604_v12 = vmax.f32 %v2688_v8, 0.0 }
 0x54a   : > { %v1605_v15 = vmax.f32 %v2689_v10, 0.0 }
 0x54b   : > { %v1606_v16 = vpack.c.bf16 %v1604_v12, %v1602_v11 }
 0x54c   : > { %v1607_v17 = vpack.c.bf16 %v1605_v15, %v1603_v14  ;;  %v3002_v15 = vld [vmem:[%s3907_s9 + $0x80] sm:$0xff]  }
 0x54d   : > { %v1618_v18 = vsel %vm686_vm1, %v1606_v16, 0 }
 0x54e   : > { %2542 = vmatprep.subr.msk.bf16.mxu0 %vm686_vm1, %v1607_v17  ;;  %vm1833_vm1 = vcmask 392192  }
 0x54f   : > { %1624 = vmatpush1.bf16.msra.mxu0 %v1618_v18  ;;  %v3003_v18 = vld [vmem:[%s3907_s9 + $0x88] sm:$0xff]  }
 0x552   : > { %2543 = vmatmul.mubr.msk.bf16.vlgmr.msra.gmra.mrb[12].mxu0 %vm1613_vm15, %v2955_v30  ;;  %v3004_v30 = vld [vmem:[%s3907_s9 + $0x90] sm:$0xff]  }
 0x625   : > { %v1657_v21 = vpop.f32.mrb[12].mxu0 }
 0x626   : > { %v1659_v22 = vpop.f32.mrb[13].mxu0  ;;  %v1671_v24 = vrot.slane %v1657_v21, 5 }
 0x627   : > { %v1661_v23 = vpop.f32.mrb[14].mxu0  ;;  %v1674_v7 = vrot.slane %v1659_v22, 5 }
 0x628   : > { %v1672_v25 = vrot.slane %v1661_v23, 5  ;;  %v1663_v26 = vpop.f32.mrb[15].mxu0  ;;  %v3011_v23 = vld [vmem:[%s3909_s11] sm:$0xff]  }
 0x629   : > { %v1675_v13 = vrot.slane %v1663_v26, 5  ;;  %v3014_v26 = vld [vmem:[%s3909_s11 + $0x18] sm:$0xff]  }
 0x62a   : > { %v1673_v27 = vsel %vm1670_vm0, %v1671_v24, %v1672_v25  ;;  %v3100_v24 = vmov 0.0   ;;  %v3012_v25 = vld [vmem:[%s3909_s11 + $0x8] sm:$0xff]  }
 0x62b   : > { %v1679_v29 = vmax.f32 %v1657_v21, %v1673_v27  ;;  %v1676_v32 = vsel %vm1670_vm0, %v1674_v7, %v1675_v13  ;;  %2650 = vmatprep.subr.bf16.mxu0 %v3100_v24  ;;  %v3015_v7 = vld [vmem:[%s3909_s11 + $0x20] sm:$0xff]   ;;  %v3016_v13 = vld [vmem:[%s3909_s11 + $0x28] sm:$0xff]   ;;  %v3017_v27 = vld [vmem:[%s3909_s11 + $0x30] sm:$0xff]  }
 0x62c   : > { %v1680_v34 = vmax.f32 %v1659_v22, %v1676_v32  ;;  %2651 = vmatpush3.bf16.msra.mxu0 %v3011_v23 }
 0x62d   : > { %v1681_v36 = vpack.c.bf16 %v1679_v29, %v1679_v29  ;;  %2652 = vmatprep.subr.bf16.mxu0 %v3100_v24  ;;  %v3018_v29 = vld [vmem:[%s3909_s11 + $0x38] ss:$0 sps:$4 sm:$0xff]  }
 0x62e   : > { %v1682_v35 = vpack.c.bf16 %v1680_v34, %v1680_v34  ;;  %v2216_v32 = vsel %vm706_vm3, %v3018_v29, 0  ;;  %v3019_v34 = vld [vmem:[%s3911_s13] sm:$0xff]   ;;  %vm2211_vm3 = vcmask 982016  }
 0x630   : > { %2564 = vmatprep.mubr.msk.bf16.mxu1 %vm718_vm4, %v1682_v35  ;;  %2653 = vmatpush3.bf16.msra.mxu0 %v3012_v25  ;;  %v3020_v35 = vld [vmem:[%s3911_s13 + $0x8] sm:$0xff]  }
 0x631   : > { %1819 = vmatmul.mubr.bf16.vlgmr.msra.gmra.mrb[12].mxu1 %v1681_v36  ;;  %2654 = vmatprep.subr.bf16.mxu0 %v3100_v24  ;;  %v3021_v36 = vld [vmem:[%s3911_s13 + $0x10] sm:$0xff]  }
 0x632   : > { %2613 = vmatpush3.bf16.msra.mxu1 %v2987_v42 }
 0x633   : > { %2614 = vmatprep.subr.bf16.mxu1 %v2988_v43  ;;  %v1913_v43 = vld [vmem:[%s3908_s10] sm:$0x1] }
 0x636   : > { %2615 = vmatpush3.bf16.msra.mxu1 %v2989_v45 }
 0x637   : > { %2616 = vmatprep.subr.bf16.mxu1 %v2990_v46 }
 0x63a   : > { %2617 = vmatpush3.bf16.msra.mxu1 %v2991_v47 }
 0x63b   : > { %2618 = vmatprep.subr.bf16.mxu1 %v2992_v48 }
 0x63e   : > { %2619 = vmatpush3.bf16.msra.mxu1 %v2993_v49 }
 0x63f   : > { %2620 = vmatprep.subr.bf16.mxu1 %v2994_v50 }
 0x642   : > { %2621 = vmatpush3.bf16.msra.mxu1 %v2995_v51 }
 0x643   : > { %2622 = vmatprep.subr.bf16.mxu1 %v2996_v52  ;;  %v3023_v52 = vld [vmem:[%s3911_s13 + $0x20] sm:$0xff]  }
 0x646   : > { %2623 = vmatpush3.bf16.msra.mxu1 %v2997_v53  ;;  %v3024_v53 = vld [vmem:[%s3911_s13 + $0x28] ss:$0 sps:$4 sm:$0x33]  }
 0x647   : > { %2624 = vmatprep.subr.bf16.mxu1 %v2998_v54  ;;  %v2309_v54 = vsel %vm990_vm8, %v3024_v53, 0 }
 0x64a   : > { %2625 = vmatpush3.bf16.msra.mxu1 %v2999_v55  ;;  %v2165_v55 = vld [vmem:[%s3910_s12] sm:$0x1] }
 0x64b   : > { %2626 = vmatprep.subr.bf16.mxu1 %v3000_v56 }
 0x64e   : > { %2627 = vmatpush3.bf16.msra.mxu1 %v3001_v57 }
 0x64f   : > { %2108 = vmatprep.subr.bf16.mxu1 %v3092_v28 }
 0x704   : > { %v1820_v37 = vpop.f32.mrb[12].mxu1 }
 0x705   : > { %v1822_v38 = vpop.f32.mrb[13].mxu1 }
 0x706   : > { %v2806_v39 = vpack.i.bf16 %v1822_v38, %v1820_v37  ;;  %v1824_v40 = vpop.f32.mrb[14].mxu1 }
 0x707   : > { %v1825_v44 = vpop.f32.mrb[15].mxu1 }
 0x708   : > { %2807 = vrot.lane.b32.xlu0 %v2806_v39, %s3098_s25 }
 0x77a   : > { %v2808_v58 = vpop.permute.xlu0 %2807 }
 0x77b   : > { %v2810_v59 = vunpack.i.h.bf16 %v2808_v58  ;;  %v2809_v60 = vunpack.i.l.bf16 %v2808_v58 }
 0x77d   : > { %v1834_v61 = vsel %vm1833_vm1, %v2809_v60, %v2810_v59 }
 0x77e   : > { %v1836_v62 = vmax.f32 %v1820_v37, %v1834_v61  ;;  %v3022_v37 = vld [vmem:[%s3911_s13 + $0x18] sm:$0xff]  }
 0x780   : > { %v1842_v63 = vrot.slane %v1836_v62, 2  ;;  %v1838_v0 = vrot.slane %v1836_v62, 1  ;;  %v1850_v1 = vrot.slane %v1836_v62, 4  ;;  %v1846_v2 = vrot.slane %v1836_v62, 3 }
 0x782   : > { %1843 = vrot.lane.b32.xlu0 %v1842_v63, %s3089_s29  ;;  %1839 = vrot.lane.b32.xlu1 %v1838_v0, %s3096_s21  ;;  %v2271_v63 = vld [vmem:[%s3912_s14] sm:$0x1] }
 0x786   : > { %1851 = vrot.lane.b32.xlu0 %v1850_v1, %s3091_s26  ;;  %1847 = vrot.lane.b32.xlu1 %v1846_v2, %s3099_s17  ;;  %s2431_s17 = sshll.u32 %s485_s18, 3  ;;  %s2608_s26 = sshll.u32 %s3204_s22, 7 }
 0x787   : > { %s487_s21 = scalar_lea.vmem [#allocation2], %s2431_s17  ;;  %s3856_s24 = scalar_lea.hbm %s3930_s16, %s2608_s26 }
 0x788   : > { %s2368_s23 = sshll.u32 %s487_s21, 4  ;;  %s2355_s22 = scalar_lea.sflag [#allocation3], %s485_s18  ;;  %s3858_s23 = int_to_ptr.vmem [resolvable:$true] %s2368_s23 }
 0x789   : > { %s3025_s27 = scalar_lea.vmem %s3858_s23, 128  ;;  %s3029_s17 = sshll.u32 %s3102_s15, 4  ;;  %s3030_s17 = int_to_ptr.vmem [resolvable:$false] %s3029_s17 }
 0x78a   : > { %p3026_p11 = scmp.ne.s32.totalorder %s3858_s23, %s3025_s27  ;;  %s3031_s29 = scalar_lea.vmem %s3030_s17, 256 }
 0x78b   : > { %p3032_p0 = scmp.lt.s32.totalorder %s3858_s23, %s3030_s17  ;;  %p3033_p1 = scmp.lt.s32.totalorder %s3031_s29, %s3025_s27 }
 0x78c   : > { %p3027_p12 = pnand %p3026_p11, %p3221_p5 }
 0x78d   : > { %p3034_p2 = por %p3033_p1, %p3032_p0 }
 0x78e   : > { %p3028_p13 = pneg %p3027_p12 }
 0x790   : > { %p3035_p3 = pnand %p3034_p2, %p3028_p13 }
 0x7f4   : > { %v1844_v3 = vpop.permute.xlu0 %1843  ;;  %v1840_v4 = vpop.permute.xlu1 %1839 }
 0x7f5   : > { %v1854_v8 = vsel %vm1234_vm14, %v1836_v62, %v1840_v4  ;;  %v1855_v9 = vsel %vm718_vm4, %v1840_v4, %v1844_v3  ;;  %vm3101_vm4 = vmmov 0  }
 0x7f6   : > { %v1859_v16 = vpack.c.bf16 %v1854_v8, %v1854_v8  ;;  %2666 = vmatprep.mubr.msk.bf16.mxu0 %vm3101_vm4, %v3100_v24 }
 0x7f8   : > { %v1848_v10 = vpop.permute.xlu1 %1847  ;;  %v1852_v11 = vpop.permute.xlu0 %1851 }
 0x7f9   : > { %v1857_v12 = vsel %vm1856_vm2, %v1855_v9, %v1848_v10  ;;  %v1862_v17 = vpack.c.bf16 %v1852_v11, %v1852_v11  ;;  %v1858_v21 = vsel %vm723_vm5, %v1848_v10, %v1852_v11  ;;  %vm2351_vm5 = vcmask 1040384  }
 0x7fa   : > { %v1860_v14 = vpack.c.bf16 %v1857_v12, %v1857_v12  ;;  %v1861_v22 = vpack.c.bf16 %v1858_v21, %v1858_v21 }
 0x7fc   : > { %2100 = vmatprep.mubr.bf16.mxu1 %v1860_v14 }
 0x7fd   : > { %2101 = vmatmul.mubr.bf16.vlgmr.msra.gmra.mrb[16].mxu1 %v1859_v16 }
 0x7fe   : > { %2109 = vmatpush1.bf16.msra.mxu1 %v3002_v15  ;;  %2590 = vmatprep.mubr.msk.bf16.mxu1 %vm2064_vm6, %v1862_v17 }
 0x7ff   : > { %2110 = vmatprep.subr.bf16.mxu1 %v3092_v28 }
 0x802   : > { %2111 = vmatpush1.bf16.msra.mxu1 %v3003_v18 }
 0x803   : > { %2112 = vmatprep.subr.bf16.mxu1 %v3092_v28 }
 0x806   : > { %2113 = vmatpush1.bf16.msra.mxu1 %v3004_v30 }
 0x807   : > { %2114 = vmatprep.subr.bf16.mxu1 %v3092_v28 }
 0x80a   : > { %2115 = vmatpush1.bf16.msra.mxu1 %v3005_v31 }
 0x80b   : > { %2116 = vmatprep.subr.bf16.mxu1 %v3092_v28 }
 0x80e   : > { %2117 = vmatpush1.bf16.msra.mxu1 %v3006_v33 }
 0x80f   : > { %2118 = vmatprep.subr.bf16.mxu1 %v3092_v28 }
 0x812   : > { %2119 = vmatpush1.bf16.msra.mxu1 %v3007_v19 }
 0x813   : > { %2120 = vmatprep.subr.bf16.mxu1 %v3092_v28 }
 0x816   : > { %2121 = vmatpush1.bf16.msra.mxu1 %v3008_v6 }
 0x817   : > { %2122 = vmatprep.subr.bf16.mxu1 %v3092_v28 }
 0x81a   : > { %2123 = vmatpush1.bf16.msra.mxu1 %v3009_v20 }
 0x81b   : > { %2124 = vmatprep.subr.bf16.mxu1 %v3092_v28  ;;  %v3013_v28 = vld [vmem:[%s3909_s11 + $0x10] sm:$0xff]  }
 0x81c   : > { %2655 = vmatpush3.bf16.msra.mxu0 %v3013_v28 }
 0x81d   : > { %2656 = vmatprep.subr.bf16.mxu0 %v3100_v24 }
 0x81e   : > { %2125 = vmatpush1.bf16.msra.mxu1 %v3010_v5 }
 0x81f   : > { %2670 = vmatprep.subr.bf16.mxu1 %v3100_v24 }
 0x820   : > { %2657 = vmatpush3.bf16.msra.mxu0 %v3014_v26 }
 0x821   : > { %2141 = vmatmul.mubr.bf16.vlgmr.msra.gmra.mrb[20].mxu1 %v1861_v22  ;;  %2658 = vmatprep.subr.bf16.mxu0 %v3100_v24 }
 0x822   : > { %2682 = vmatprep.mubr.msk.bf16.mxu1 %vm3101_vm4, %v3100_v24  ;;  %2671 = vmatpush3.bf16.msra.mxu1 %v3019_v34 }
 0x823   : > { %2672 = vmatprep.subr.bf16.mxu1 %v3100_v24 }
 0x824   : > { %2659 = vmatpush3.bf16.msra.mxu0 %v3015_v7 }
 0x825   : > { %2660 = vmatprep.subr.bf16.mxu0 %v3100_v24 }
 0x826   : > { %2673 = vmatpush3.bf16.msra.mxu1 %v3020_v35 }
 0x827   : > { %2674 = vmatprep.subr.bf16.mxu1 %v3100_v24 }
 0x828   : > { %2661 = vmatpush3.bf16.msra.mxu0 %v3016_v13 }
 0x829   : > { %2662 = vmatprep.subr.bf16.mxu0 %v3100_v24 }
 0x82a   : > { %2675 = vmatpush3.bf16.msra.mxu1 %v3021_v36 }
 0x82b   : > { %2676 = vmatprep.subr.bf16.mxu1 %v3100_v24 }
 0x82c   : > { %2663 = vmatpush3.bf16.msra.mxu0 %v3017_v27 }
 0x82d   : > { %2664 = vmatprep.subr.bf16.mxu0 %v3100_v24 }
 0x82e   : > { %2677 = vmatpush3.bf16.msra.mxu1 %v3022_v37 }
 0x82f   : > { %2678 = vmatprep.subr.bf16.mxu1 %v3100_v24 }
 0x830   : > { %2665 = vmatpush3.bf16.msra.mxu0 %v2216_v32 }
 0x832   : > { %2679 = vmatpush3.bf16.msra.mxu1 %v3023_v52 }
 0x833   : > { %2680 = vmatprep.subr.bf16.mxu1 %v3100_v24 }
 0x836   : > { %2681 = vmatpush3.bf16.msra.mxu1 %v2309_v54 }
 0x8d0   : > { %v2628_v38 = vpop.f32.mrb[16].mxu1 }
 0x8d1   : > { %v2629_v39 = vpop.f32.mrb[17].mxu1 }
 0x8d2   : > { %v2630_v40 = vadd.f32 %v2629_v39, %v2628_v38  ;;  %v2631_v41 = vpop.f32.mrb[18].mxu1 }
 0x8d3   : > { %v2632_v42 = vpop.f32.mrb[19].mxu1 }
 0x8d4   : > { %v2103_v44 = vadd.f32 %v2630_v40, %v1913_v43 }
 0x8f4   : > { %v2142_v45 = vpop.f32.mrb[20].mxu1 }
 0x8f5   : > { %v2143_v46 = vadd.f32 %v2142_v45, %v2103_v44  ;;  %v2144_v47 = vpop.f32.mrb[21].mxu1 }
 0x8f6   : > { %v2145_v48 = vpop.f32.mrb[22].mxu1 }
 0x8f7   : > { %v2148_v49 = vmax.f32 %v2143_v46, 0.0  ;;  %v2146_v50 = vpop.f32.mrb[23].mxu1 }
 0x8f9   : > { %v2149_v51 = vpack.c.bf16 %v2148_v49, %v2148_v49 }
 0x8fb   : > { %2667 = vmatmul.mubr.msk.bf16.vlgmr.msra.gmra.mrb[16].mxu0 %vm2211_vm3, %v2149_v51 }
 0x9ce   : > { %v2252_v56 = vpop.f32.mrb[16].mxu0 }
 0x9cf   : > { %v2253_v57 = vadd.f32 %v2252_v56, %v2165_v55  ;;  %v2668_v58 = vpop.f32.mrb[17].mxu0 }
 0x9d0   : > { %v2255_v59 = vpop.f32.mrb[18].mxu0 }
 0x9d1   : > { %v2258_v60 = vmax.f32 %v2253_v57, 0.0  ;;  %v2669_v61 = vpop.f32.mrb[19].mxu0 }
 0x9d3   : > { %v2259_v62 = vpack.c.bf16 %v2258_v60, %v2258_v60 }
 0x9d5   : > { %2683 = vmatmul.mubr.msk.bf16.vlgmr.msra.gmra.mrb[24].mxu1 %vm1226_vm11, %v2259_v62 }
 0xaa8   : > { %v2345_v0 = vpop.f32.mrb[24].mxu1 }
 0xaa9   : > { %v2346_v1 = vadd.f32 %v2345_v0, %v2271_v63  ;;  %v2684_v2 = vpop.f32.mrb[25].mxu1 }
 0xaaa   : > { %v2348_v3 = vpop.f32.mrb[26].mxu1 }
 0xaab   : > { %v2352_v4 = vsel %vm2351_vm5, %v2346_v1, 0.0  ;;  %v2685_v8 = vpop.f32.mrb[27].mxu1 }
 0xaac   : > { %2353 = vst [vmem:[%s487_s21] sm:$0xff] %v2352_v4 }
 0xaad   : > { %3038 = shalt.err (!%p3035_p3)
}
 0xaae   : > { %s3039_s18 = scalar_lea.hbm %s3856_s24, 128  ;;  %s3043_s21 = scalar_lea.hbm %s3930_s16, 256 }
 0xaaf   : > { %p3040_p4 = scmp.ne.s32.totalorder %s3856_s24, %s3039_s18  ;;  %p3044_p9 = scmp.lt.u32.totalorder %s3856_s24, %s3930_s16 }
 0xab0   : > { %p3045_p10 = scmp.lt.u32.totalorder %s3043_s21, %s3039_s18  ;;  %p3047_p12 = scmp.lt.u32.totalorder %s3039_s18, %s3856_s24 }
 0xab1   : > { %p3041_p7 = pnand %p3040_p4, %p3221_p5 }
 0xab2   : > { %p3046_p11 = por %p3045_p10, %p3044_p9 }
 0xab3   : > { %p3042_p8 = pneg %p3041_p7 }
 0xab4   : > { %p3048_p13 = por %p3047_p12, %p3046_p11 }
 0xab6   : > { %p3049_p0 = pnand %p3048_p13, %p3042_p8 }
 0xab8   : > { %3052 = shalt.err (!%p3049_p0)
}
 0xab9   : > { %2694 = dma.vmem_to_hbm [thread:$0]  (%p3221_p5), %s3858_s23, 128, %s3856_s24, %s2355_s22  }
 0xaba PF: > { %s3931_s27 = sld [smem:[#allocation7_spill]]  ;;  %s3932_s15 = sld [smem:[#allocation5_spill]] }
 0xac0   : > { %p2700_p1 = scmp.ge.s32.totalorder %s3931_s27, 2  ;;  %s2380_s29 = sand.u32 1, %s3932_s15  }
 0xac1   : > { %s2381_s20 = scalar_lea.sflag [#allocation3], %s2380_s29 }
 0xac2   : > { %p2697_p2 = pnand %p2700_p1, %p3225_p6 }
 0xac4   : > { %3070 = dma.done.wait (!%p2697_p2), %s2381_s20, 128  }
 0xac5   : > { %3072 = vsyncadd (!%p2697_p2), %s2381_s20, 4294967168  ;;  %s3934_s21 = sld [smem:[#allocation8_spill]]  ;;  %s3935_s26 = sld [smem:[#allocation6_spill]] }
 0xac6   : > { %s3936_s20 = sld [smem:[#allocation9_spill]]  ;;  %s3937_s18 = smov %s3079_s19 }
 0xacb   : > { %p25_p3 = scmp.ge.s32.totalorder %s3934_s21, 4   ;;  %s3938_s19 = smov %s3935_s26 }
 0xacd   :  { %27 = sbr.rel (!%p25_p3) target bundleno = 5 (0x5), region = 115 }
 0xad4   :  { %2386 = vsyncpa [#allocation3], 1 }
 0xad5   :  { %2388 = vsyncpa [#allocation3 + $0x1], 1 }

</bundles_post_ra>
